<compile_context>
chip_gen: v6e
topology: v6e:2x2x1
jax: 0.10.0
libtpu: 0.0.40
codegen_flags: <defaults>
</compile_context>

<pallas_src>
import functools

import numpy as np
import jax
import jax.numpy as jnp
from jax import lax
from jax.experimental import pallas as pl
from jax.experimental.pallas import tpu as pltpu

# ------------------------- small config (consistent with the forward) ----------
B = 2                       # batch
TEXT_SEQ_LEN = 8
NUM_TEXT_TOKENS = 32
IMG_C, IMG_H, IMG_W = 3, 16, 16
PATCH = 8
FMAP = IMG_H // PATCH                   # 2
IMAGE_SEQ_LEN = FMAP * FMAP             # 4
NUM_IMAGE_TOKENS = 16                   # VAE codebook size
DIM = 32                                # model hidden dim
FF_DIM = 4 * DIM                        # 128
TOTAL_TOKENS = NUM_TEXT_TOKENS + NUM_IMAGE_TOKENS  # 48 real classes
C_PAD = 128                             # lane-dense padded class axis
SEQ_LEN = TEXT_SEQ_LEN + IMAGE_SEQ_LEN  # logits length n (after 1-token truncation)
LOSS_IMG_WEIGHT = 7.0                   # dalle-pytorch default
FORWARD_BATCH_SIZE = 256
PATCH_DIM = IMG_C * PATCH * PATCH       # 192
NEG = -1e9                              # safe finite mask / pad value


# ------------------------------ fused Pallas kernel -----------------------------
def dalle_fused_kernel(
    # per-step (streamed) inputs
    patches_ref, text_oh_ref, text_lab_oh_ref,
    # per-tile resident geometry (constant index maps, O(TB^2) only)
    sel_tseq_ref, sel_iseq_ref, sel_trow_ref, sel_irow_ref,
    mask_ref, pos_ref,
    # resident parameters
    vae_w_ref, vae_b_ref, vae_cbT_ref,
    temb_ref, iemb_ref,
    wq_ref, wk_ref, wv_ref, wo_ref,
    w1_ref, b1_ref, w2_ref, b2_ref,
    g_ref, beta_ref, wout_ref, bout_ref,
    # output: (8, C_PAD) tile, row 0 lane 0/1 = text / image NLL sums
    out_ref,
):
    f32 = jnp.float32

    # ---- VAE tokenizer: patches -> discrete codebook indices (argmax) --------
    patches = patches_ref[...]                                        # (TB*P, 192)
    h = jnp.dot(patches, vae_w_ref[...], preferred_element_type=f32) + vae_b_ref[...]
    h = jax.nn.gelu(h, approximate=True)
    vlogits = jnp.dot(h, vae_cbT_ref[...], preferred_element_type=f32)  # (TB*P, K)
    kio = lax.broadcasted_iota(jnp.int32, vlogits.shape, 1)
    vmax = jnp.max(vlogits, axis=-1, keepdims=True)
    first_hit = jnp.where(vlogits == vmax, kio, NUM_IMAGE_TOKENS)
    img_tok = jnp.min(first_hit, axis=-1, keepdims=True)              # (TB*P, 1) first argmax
    img_emb_oh = (kio == img_tok).astype(f32)                         # (TB*P, K)

    # ---- token + positional embeddings (one-hot MXU gathers, all 2D) ---------
    tok_text = jnp.dot(text_oh_ref[...], temb_ref[...], preferred_element_type=f32)
    tok_img = jnp.dot(img_emb_oh, iemb_ref[...], preferred_element_type=f32)

    # assemble the per-tile (TB*SEQ_LEN, DIM) sequence slab
    x = (jnp.dot(sel_tseq_ref[...], tok_text, preferred_element_type=f32)
         + jnp.dot(sel_iseq_ref[...], tok_img, preferred_element_type=f32)
         + pos_ref[...])

    # ---- causal single-head transformer block (block-diag within the tile) ---
    q = jnp.dot(x, wq_ref[...], preferred_element_type=f32)
    k = jnp.dot(x, wk_ref[...], preferred_element_type=f32)
    v = jnp.dot(x, wv_ref[...], preferred_element_type=f32)
    scores = lax.dot_general(q, k, (((1,), (1,)), ((), ())),
                             preferred_element_type=f32)              # (Nt, Nt), no .T
    scores = scores * (1.0 / (DIM ** 0.5))
    scores = jnp.where(mask_ref[...] != 0.0, scores, NEG)             # select, not add
    smax = jnp.max(scores, axis=-1, keepdims=True)
    p = jnp.exp(scores - smax)
    p = p * pl.reciprocal(jnp.sum(p, axis=-1, keepdims=True), approx=True)
    attn = jnp.dot(p, v, preferred_element_type=f32)
    x = x + jnp.dot(attn, wo_ref[...], preferred_element_type=f32)

    hh = jnp.dot(x, w1_ref[...], preferred_element_type=f32) + b1_ref[...]
    hh = jax.nn.gelu(hh, approximate=True)
    x = x + jnp.dot(hh, w2_ref[...], preferred_element_type=f32) + b2_ref[...]

    mu = jnp.mean(x, axis=-1, keepdims=True)
    var = jnp.mean((x - mu) ** 2, axis=-1, keepdims=True)
    xn = (x - mu) * lax.rsqrt(var + 1e-5) * g_ref[...] + beta_ref[...]

    # lane-dense padded logits; padded class columns carry -1e9 bias
    logits = jnp.dot(xn, wout_ref[...], preferred_element_type=f32) + bout_ref[...]

    # ---- cross-entropy epilogue (logits never leave vregs) --------------------
    lmax = jnp.max(logits, axis=-1, keepdims=True)
    lse = jnp.log(jnp.sum(jnp.exp(logits - lmax), axis=-1, keepdims=True)) + lmax

    icol = lax.broadcasted_iota(jnp.int32, (img_tok.shape[0], C_PAD), 1)
    img_lab_oh = (icol == (img_tok + NUM_TEXT_TOKENS)).astype(f32)    # (TB*P, C_PAD)

    label_oh = (jnp.dot(sel_trow_ref[...], text_lab_oh_ref[...],
                        preferred_element_type=f32)
                + jnp.dot(sel_irow_ref[...], img_lab_oh,
                          preferred_element_type=f32))                # (Nt, C_PAD)

    picked = jnp.sum(logits * label_oh, axis=-1, keepdims=True)       # (Nt, 1)
    nll = lse - picked

    text_mask = jnp.sum(sel_trow_ref[...], axis=-1, keepdims=True)    # (Nt, 1)
    img_mask = jnp.sum(sel_irow_ref[...], axis=-1, keepdims=True)
    text_sum = jnp.sum(nll * text_mask)
    img_sum = jnp.sum(nll * img_mask)

    row = lax.broadcasted_iota(jnp.int32, (8, C_PAD), 0)
    col = lax.broadcasted_iota(jnp.int32, (8, C_PAD), 1)
    out_ref[...] = (jnp.where((row == 0) & (col == 0), text_sum, 0.0)
                    + jnp.where((row == 0) & (col == 1), img_sum, 0.0))


# ------------------------------ per-tile constant geometry ----------------------
@functools.lru_cache(maxsize=None)
def _tile_geometry(tb):
    """Static selection matrices / block-diag causal mask for TB examples.

    These are O(TB * SEQ_LEN) sized (tens of KiB), VMEM-resident across the
    whole grid — NOT O(chunk_batch^2).
    """
    n = tb * SEQ_LEN
    sel_tseq = np.zeros((n, tb * (TEXT_SEQ_LEN + 1)), np.float32)
    sel_iseq = np.zeros((n, tb * IMAGE_SEQ_LEN), np.float32)
    sel_trow = np.zeros((n, tb * TEXT_SEQ_LEN), np.float32)
    sel_irow = np.zeros((n, tb * IMAGE_SEQ_LEN), np.float32)
    mask = np.zeros((n, n), np.float32)
    for e in range(tb):
        for j in range(SEQ_LEN):
            r = e * SEQ_LEN + j
            # sequence construction: [<bos> + 8 text tokens (9)] + [img tok 0..2 (3)]
            if j < TEXT_SEQ_LEN + 1:
                sel_tseq[r, e * (TEXT_SEQ_LEN + 1) + j] = 1.0
            else:
                sel_iseq[r, e * IMAGE_SEQ_LEN + (j - (TEXT_SEQ_LEN + 1))] = 1.0
            # label selection: positions 0..7 -> text labels, 8..11 -> image labels
            if j < TEXT_SEQ_LEN:
                sel_trow[r, e * TEXT_SEQ_LEN + j] = 1.0
            else:
                sel_irow[r, e * IMAGE_SEQ_LEN + (j - TEXT_SEQ_LEN)] = 1.0
        # block-diagonal causal mask (1 = attend)
        for ji in range(SEQ_LEN):
            for jj in range(ji + 1):
                mask[e * SEQ_LEN + ji, e * SEQ_LEN + jj] = 1.0
    return (jnp.asarray(sel_tseq), jnp.asarray(sel_iseq),
            jnp.asarray(sel_trow), jnp.asarray(sel_irow), jnp.asarray(mask))


def _pick_tile(cb):
    """Examples per grid step; keeps per-step rows a multiple of 8 when possible."""
    for tb in (32, 16, 8):
        if cb >= tb and cb % tb == 0:
            return tb
    return cb  # tiny / irregular batch: single grid step, full-array blocks


# ------------------------------ fused wrapper ------------------------------------
def dalle_chunk_loss_sums(params, input_ids, images):
    """One batch chunk -> (sum of text NLL, sum of image NLL)."""
    cb = images.shape[0]
    tb = _pick_tile(cb)
    g = cb // tb
    n_tile = tb * SEQ_LEN

    # NCHW -> NHWC -> non-overlapping patches (cb*image_seq_len, C*ps*ps)
    x = jnp.transpose(images, (0, 2, 3, 1))
    x = x.reshape(cb, FMAP, PATCH, FMAP, PATCH, IMG_C)
    patches = jnp.transpose(x, (0, 1, 3, 2, 4, 5)).reshape(
        cb * IMAGE_SEQ_LEN, PATCH_DIM)

    # prepend <bos>=0 (F.pad(text, (1, 0), value=0)); lane-dense one-hots built
    # with plain XLA so the kernel never sees width-1 int columns.
    text = jnp.pad(input_ids, ((0, 0), (1, 0)), constant_values=0)
    text_oh = jax.nn.one_hot(text.reshape(cb * (TEXT_SEQ_LEN + 1)),
                             NUM_TEXT_TOKENS, dtype=jnp.float32)
    text_lab_oh = jax.nn.one_hot(input_ids.reshape(cb * TEXT_SEQ_LEN),
                                 C_PAD, dtype=jnp.float32)

    sel_tseq, sel_iseq, sel_trow, sel_irow, mask = _tile_geometry(tb)

    # positional slab for ONE tile (resident constant, not re-sent per example)
    pos_single = jnp.concatenate(
        [params['text_pos'], params['image_pos'][:IMAGE_SEQ_LEN - 1]], axis=0)
    pos_tile = jnp.tile(pos_single, (tb, 1))                            # (n_tile, DIM)

    vae_cbT = params['vae_codebook'].T                                  # (DIM, K)

    def per_step(rows, cols):
        return pl.BlockSpec((rows, cols), lambda i: (i, 0))

    def const(shape):
        nd = len(shape)
        return pl.BlockSpec(shape, lambda i, _nd=nd: (0,) * _nd)

    out = pl.pallas_call(
        dalle_fused_kernel,
        out_shape=jax.ShapeDtypeStruct((g * 8, C_PAD), jnp.float32),
        grid=(g,),
        in_specs=[
            # streamed per step (double-buffered by the Pallas pipeline)
            per_step(tb * IMAGE_SEQ_LEN, PATCH_DIM),                 # patches
            per_step(tb * (TEXT_SEQ_LEN + 1), NUM_TEXT_TOKENS),      # text one-hot
            per_step(tb * TEXT_SEQ_LEN, C_PAD),                      # text label one-hot
            # VMEM-resident per-tile geometry (DMA'd once)
            const((n_tile, tb * (TEXT_SEQ_LEN + 1))),                # sel_tseq
            const((n_tile, tb * IMAGE_SEQ_LEN)),                     # sel_iseq
            const((n_tile, tb * TEXT_SEQ_LEN)),                      # sel_trow
            const((n_tile, tb * IMAGE_SEQ_LEN)),                     # sel_irow
            const((n_tile, n_tile)),                                 # block-diag causal mask
            const((n_tile, DIM)),                                    # positional tile
            # VMEM-resident parameters (DMA'd once)
            const((PATCH_DIM, DIM)),                                 # vae_w_enc
            const((1, DIM)),                                         # vae_b_enc
            const((DIM, NUM_IMAGE_TOKENS)),                          # codebook^T
            const((NUM_TEXT_TOKENS, DIM)),                           # text_emb
            const((NUM_IMAGE_TOKENS, DIM)),                          # image_emb
            const((DIM, DIM)), const((DIM, DIM)),                    # wq, wk
            const((DIM, DIM)), const((DIM, DIM)),                    # wv, wo
            const((DIM, FF_DIM)), const((1, FF_DIM)),                # w1, b1
            const((FF_DIM, DIM)), const((1, DIM)),                   # w2, b2
            const((1, DIM)), const((1, DIM)),                        # ln_g, ln_b
            const((DIM, C_PAD)), const((1, C_PAD)),                  # w_out, b_out
        ],
        out_specs=pl.BlockSpec((8, C_PAD), lambda i: (i, 0)),
        compiler_params=pltpu.CompilerParams(
            dimension_semantics=("parallel",),            # megacore splits the batch grid
            vmem_limit_bytes=32 * 1024 * 1024,            # real working set << 1 MiB
        ),
    )(patches, text_oh, text_lab_oh,
      sel_tseq, sel_iseq, sel_trow, sel_irow, mask, pos_tile,
      params['vae_w_enc'], params['vae_b_enc'], vae_cbT,
      params['text_emb'], params['image_emb'],
      params['wq'], params['wk'], params['wv'], params['wo'],
      params['w1'], params['b1'], params['w2'], params['b2'],
      params['ln_g'], params['ln_b'], params['w_out'], params['b_out'])

    # only row 0 of each per-step (8, C_PAD) tile is non-zero
    return jnp.sum(out[:, 0]), jnp.sum(out[:, 1])


# ------------------------------ model glue (plain JAX) --------------------------
def init_params(key):
    ks = jax.random.split(key, 16)
    s = 0.02

    def nrm(k, shape):
        return (s * jax.random.normal(k, shape)).astype(jnp.float32)

    # to_logits padded to a lane-dense 128 class axis; padded bias columns = -1e9
    w_out = jnp.zeros((DIM, C_PAD), jnp.float32)
    w_out = w_out.at[:, :TOTAL_TOKENS].set(nrm(ks[10], (DIM, TOTAL_TOKENS)))
    b_out = jnp.concatenate(
        [jnp.zeros((1, TOTAL_TOKENS), jnp.float32),
         jnp.full((1, C_PAD - TOTAL_TOKENS), NEG, jnp.float32)], axis=1)

    kq, kk, kv = jax.random.split(ks[6], 3)
    return {
        # synthetic VAE encoder (patch embed + codebook)
        'vae_w_enc': nrm(ks[0], (PATCH_DIM, DIM)),
        'vae_b_enc': jnp.zeros((1, DIM), jnp.float32),
        'vae_codebook': nrm(ks[1], (NUM_IMAGE_TOKENS, DIM)),
        # embeddings
        'text_emb': nrm(ks[2], (NUM_TEXT_TOKENS, DIM)),
        'image_emb': nrm(ks[3], (NUM_IMAGE_TOKENS, DIM)),
        'text_pos': nrm(ks[4], (TEXT_SEQ_LEN + 1, DIM)),
        'image_pos': nrm(ks[5], (IMAGE_SEQ_LEN, DIM)),
        # transformer block (separate q/k/v — no lane-offset slicing in-kernel)
        'wq': nrm(kq, (DIM, DIM)),
        'wk': nrm(kk, (DIM, DIM)),
        'wv': nrm(kv, (DIM, DIM)),
        'wo': nrm(ks[7], (DIM, DIM)),
        'w1': nrm(ks[8], (DIM, FF_DIM)),
        'b1': jnp.zeros((1, FF_DIM), jnp.float32),
        'w2': nrm(ks[9], (FF_DIM, DIM)),
        'b2': jnp.zeros((1, DIM), jnp.float32),
        'ln_g': jnp.ones((1, DIM), jnp.float32),
        'ln_b': jnp.zeros((1, DIM), jnp.float32),
        'w_out': w_out,
        'b_out': b_out,
    }


@jax.jit
def dalle_module_forward(params, input_ids, attention_mask, images):
    """Mirror of DALLE.forward (attention_mask received but unused, as in torch)."""
    del attention_mask
    bs = images.shape[0]
    fbs = min(FORWARD_BATCH_SIZE, bs)
    n_chunks = bs // fbs   # matches torch: int(bs / min(fbs, bs)) — remainder dropped

    text_sum = jnp.float32(0.0)
    img_sum = jnp.float32(0.0)
    for i in range(n_chunks):
        ts, isum = dalle_chunk_loss_sums(
            params,
            input_ids[i * fbs:(i + 1) * fbs],
            images[i * fbs:(i + 1) * fbs])
        text_sum = text_sum + ts
        img_sum = img_sum + isum

    total = n_chunks * fbs
    loss_text = text_sum / jnp.float32(total * TEXT_SEQ_LEN)
    loss_img = img_sum / jnp.float32(total * IMAGE_SEQ_LEN)
    loss = (loss_text + LOSS_IMG_WEIGHT * loss_img) / (LOSS_IMG_WEIGHT + 1.0)
    return {'loss': loss}


# ------------------------------ entry point -------------------------------------
if __name__ == "__main__":
    key = jax.random.PRNGKey(0)
    k_ids, k_img = jax.random.split(key, 2)
    input_ids = jax.random.randint(k_ids, (B, TEXT_SEQ_LEN), 0, NUM_TEXT_TOKENS,
                                   dtype=jnp.int32)
    attention_mask = jnp.ones((B, TEXT_SEQ_LEN), dtype=jnp.int32)
    images = jax.random.normal(k_img, (B, IMG_C, IMG_H, IMG_W), dtype=jnp.float32)

    # TODO(synk): original module loads a pretrained VAE checkpoint (torch.load);
    # synthetic deterministic parameters are used here instead.
    params = init_params(jax.random.PRNGKey(1))

    out = dalle_module_forward(params, input_ids, attention_mask, images)
    loss = jax.block_until_ready(out['loss'])
    assert loss.shape == () and jnp.isfinite(loss)
    print("KERNEL_OK")
</pallas_src>

<mosaic_0001>
module attributes {stable_mosaic.version = 11 : i64} {
  func.func @dalle_fused_kernel(%arg0: i32, %arg1: memref<8x192xf32, #tpu.memory_space<vmem>>, %arg2: memref<18x32xf32, #tpu.memory_space<vmem>>, %arg3: memref<16x128xf32, #tpu.memory_space<vmem>>, %arg4: memref<24x18xf32, #tpu.memory_space<vmem>>, %arg5: memref<24x8xf32, #tpu.memory_space<vmem>>, %arg6: memref<24x16xf32, #tpu.memory_space<vmem>>, %arg7: memref<24x8xf32, #tpu.memory_space<vmem>>, %arg8: memref<24x24xf32, #tpu.memory_space<vmem>>, %arg9: memref<24x32xf32, #tpu.memory_space<vmem>>, %arg10: memref<192x32xf32, #tpu.memory_space<vmem>>, %arg11: memref<1x32xf32, #tpu.memory_space<vmem>>, %arg12: memref<32x16xf32, #tpu.memory_space<vmem>>, %arg13: memref<32x32xf32, #tpu.memory_space<vmem>>, %arg14: memref<16x32xf32, #tpu.memory_space<vmem>>, %arg15: memref<32x32xf32, #tpu.memory_space<vmem>>, %arg16: memref<32x32xf32, #tpu.memory_space<vmem>>, %arg17: memref<32x32xf32, #tpu.memory_space<vmem>>, %arg18: memref<32x32xf32, #tpu.memory_space<vmem>>, %arg19: memref<32x128xf32, #tpu.memory_space<vmem>>, %arg20: memref<1x128xf32, #tpu.memory_space<vmem>>, %arg21: memref<128x32xf32, #tpu.memory_space<vmem>>, %arg22: memref<1x32xf32, #tpu.memory_space<vmem>>, %arg23: memref<1x32xf32, #tpu.memory_space<vmem>>, %arg24: memref<1x32xf32, #tpu.memory_space<vmem>>, %arg25: memref<32x128xf32, #tpu.memory_space<vmem>>, %arg26: memref<1x128xf32, #tpu.memory_space<vmem>>, %arg27: memref<8x128xf32, #tpu.memory_space<vmem>>) attributes {dimension_semantics = [#tpu.dimension_semantics<parallel>], iteration_bounds = array<i64: 1>, scalar_prefetch = 0 : i64, scratch_operands = 0 : i64, tpu.core_type = #tpu.core_type<tc>, window_params = [{transform_indices = @transform_0, window_bounds = array<i64: 8, 192>}, {transform_indices = @transform_1, window_bounds = array<i64: 18, 32>}, {transform_indices = @transform_2, window_bounds = array<i64: 16, 128>}, {pipeline_mode = #tpu.pipeline_mode<synchronous>, transform_indices = @transform_3, window_bounds = array<i64: 24, 18>}, {pipeline_mode = #tpu.pipeline_mode<synchronous>, transform_indices = @transform_4, window_bounds = array<i64: 24, 8>}, {pipeline_mode = #tpu.pipeline_mode<synchronous>, transform_indices = @transform_5, window_bounds = array<i64: 24, 16>}, {pipeline_mode = #tpu.pipeline_mode<synchronous>, transform_indices = @transform_6, window_bounds = array<i64: 24, 8>}, {pipeline_mode = #tpu.pipeline_mode<synchronous>, transform_indices = @transform_7, window_bounds = array<i64: 24, 24>}, {pipeline_mode = #tpu.pipeline_mode<synchronous>, transform_indices = @transform_8, window_bounds = array<i64: 24, 32>}, {pipeline_mode = #tpu.pipeline_mode<synchronous>, transform_indices = @transform_9, window_bounds = array<i64: 192, 32>}, {pipeline_mode = #tpu.pipeline_mode<synchronous>, transform_indices = @transform_10, window_bounds = array<i64: 1, 32>}, {pipeline_mode = #tpu.pipeline_mode<synchronous>, transform_indices = @transform_11, window_bounds = array<i64: 32, 16>}, {pipeline_mode = #tpu.pipeline_mode<synchronous>, transform_indices = @transform_12, window_bounds = array<i64: 32, 32>}, {pipeline_mode = #tpu.pipeline_mode<synchronous>, transform_indices = @transform_13, window_bounds = array<i64: 16, 32>}, {pipeline_mode = #tpu.pipeline_mode<synchronous>, transform_indices = @transform_14, window_bounds = array<i64: 32, 32>}, {pipeline_mode = #tpu.pipeline_mode<synchronous>, transform_indices = @transform_15, window_bounds = array<i64: 32, 32>}, {pipeline_mode = #tpu.pipeline_mode<synchronous>, transform_indices = @transform_16, window_bounds = array<i64: 32, 32>}, {pipeline_mode = #tpu.pipeline_mode<synchronous>, transform_indices = @transform_17, window_bounds = array<i64: 32, 32>}, {pipeline_mode = #tpu.pipeline_mode<synchronous>, transform_indices = @transform_18, window_bounds = array<i64: 32, 128>}, {pipeline_mode = #tpu.pipeline_mode<synchronous>, transform_indices = @transform_19, window_bounds = array<i64: 1, 128>}, {pipeline_mode = #tpu.pipeline_mode<synchronous>, transform_indices = @transform_20, window_bounds = array<i64: 128, 32>}, {pipeline_mode = #tpu.pipeline_mode<synchronous>, transform_indices = @transform_21, window_bounds = array<i64: 1, 32>}, {pipeline_mode = #tpu.pipeline_mode<synchronous>, transform_indices = @transform_22, window_bounds = array<i64: 1, 32>}, {pipeline_mode = #tpu.pipeline_mode<synchronous>, transform_indices = @transform_23, window_bounds = array<i64: 1, 32>}, {pipeline_mode = #tpu.pipeline_mode<synchronous>, transform_indices = @transform_24, window_bounds = array<i64: 32, 128>}, {pipeline_mode = #tpu.pipeline_mode<synchronous>, transform_indices = @transform_25, window_bounds = array<i64: 1, 128>}, {transform_indices = @transform_26, window_bounds = array<i64: 8, 128>}]} {
    %c0 = arith.constant 0 : index
    %c0_0 = arith.constant 0 : index
    %0 = vector.load %arg1[%c0, %c0_0] : memref<8x192xf32, #tpu.memory_space<vmem>>, vector<8x192xf32>
    %c0_1 = arith.constant 0 : index
    %c0_2 = arith.constant 0 : index
    %1 = vector.load %arg10[%c0_1, %c0_2] : memref<192x32xf32, #tpu.memory_space<vmem>>, vector<192x32xf32>
    %cst = arith.constant dense<0.000000e+00> : vector<8x32xf32>
    %2 = tpu.matmul %0, %1, %cst {dimension_numbers = #tpu.dot_dimension_numbers<[1], [0], [0], [1], [0, 0, 1, 1], [], []>} : vector<8x192xf32>, vector<192x32xf32>, vector<8x32xf32> -> vector<8x32xf32>
    %c0_3 = arith.constant 0 : index
    %c0_4 = arith.constant 0 : index
    %3 = vector.load %arg11[%c0_3, %c0_4] : memref<1x32xf32, #tpu.memory_space<vmem>>, vector<1x32xf32>
    %4 = vector.broadcast %3 : vector<1x32xf32> to vector<8x32xf32>
    %5 = arith.addf %2, %4 : vector<8x32xf32>
    %6 = arith.mulf %5, %5 : vector<8x32xf32>
    %7 = arith.mulf %5, %6 : vector<8x32xf32>
    %cst_5 = arith.constant 4.471500e-02 : f32
    %8 = vector.broadcast %cst_5 : f32 to vector<8x32xf32>
    %9 = arith.mulf %8, %7 : vector<8x32xf32>
    %10 = arith.addf %5, %9 : vector<8x32xf32>
    %cst_6 = arith.constant 0.797884583 : f32
    %11 = vector.broadcast %cst_6 : f32 to vector<8x32xf32>
    %12 = arith.mulf %11, %10 : vector<8x32xf32>
    %13 = math.tanh %12 : vector<8x32xf32>
    %cst_7 = arith.constant 1.000000e+00 : f32
    %14 = vector.broadcast %cst_7 : f32 to vector<8x32xf32>
    %15 = arith.addf %14, %13 : vector<8x32xf32>
    %cst_8 = arith.constant 5.000000e-01 : f32
    %16 = vector.broadcast %cst_8 : f32 to vector<8x32xf32>
    %17 = arith.mulf %16, %15 : vector<8x32xf32>
    %18 = arith.mulf %5, %17 : vector<8x32xf32>
    %c0_9 = arith.constant 0 : index
    %c0_10 = arith.constant 0 : index
    %19 = vector.load %arg12[%c0_9, %c0_10] : memref<32x16xf32, #tpu.memory_space<vmem>>, vector<32x16xf32>
    %cst_11 = arith.constant dense<0.000000e+00> : vector<8x16xf32>
    %20 = tpu.matmul %18, %19, %cst_11 {dimension_numbers = #tpu.dot_dimension_numbers<[1], [0], [0], [1], [0, 0, 1, 1], [], []>} : vector<8x32xf32>, vector<32x16xf32>, vector<8x16xf32> -> vector<8x16xf32>
    %21 = tpu.iota {dimensions = array<i32: 1>} : vector<8x16xi32>
    %cst_12 = arith.constant dense<0xFF800000> : vector<8xf32>
    %22 = vector.multi_reduction <maximumf>, %20, %cst_12 [1] : vector<8x16xf32> to vector<8xf32>
    %23 = vector.shape_cast %22 : vector<8xf32> to vector<8x1xf32>
    %24 = vector.broadcast %23 : vector<8x1xf32> to vector<8x16xf32>
    %25 = arith.cmpf oeq, %20, %24 : vector<8x16xf32>
    %c16_i32 = arith.constant 16 : i32
    %26 = vector.broadcast %c16_i32 : i32 to vector<8x16xi32>
    %27 = arith.select %25, %21, %26 : vector<8x16xi1>, vector<8x16xi32>
    %cst_13 = arith.constant dense<2147483647> : vector<8xi32>
    %28 = vector.multi_reduction <minsi>, %27, %cst_13 [1] : vector<8x16xi32> to vector<8xi32>
    %29 = vector.shape_cast %28 : vector<8xi32> to vector<8x1xi32>
    %30 = vector.broadcast %29 : vector<8x1xi32> to vector<8x16xi32>
    %31 = arith.cmpi eq, %21, %30 : vector<8x16xi32>
    %32 = arith.extui %31 : vector<8x16xi1> to vector<8x16xi32>
    %33 = arith.sitofp %32 : vector<8x16xi32> to vector<8x16xf32>
    %c0_14 = arith.constant 0 : index
    %c0_15 = arith.constant 0 : index
    %34 = vector.load %arg2[%c0_14, %c0_15] : memref<18x32xf32, #tpu.memory_space<vmem>>, vector<18x32xf32>
    %c0_16 = arith.constant 0 : index
    %c0_17 = arith.constant 0 : index
    %35 = vector.load %arg13[%c0_16, %c0_17] : memref<32x32xf32, #tpu.memory_space<vmem>>, vector<32x32xf32>
    %cst_18 = arith.constant dense<0.000000e+00> : vector<18x32xf32>
    %36 = tpu.matmul %34, %35, %cst_18 {dimension_numbers = #tpu.dot_dimension_numbers<[1], [0], [0], [1], [0, 0, 1, 1], [], []>} : vector<18x32xf32>, vector<32x32xf32>, vector<18x32xf32> -> vector<18x32xf32>
    %c0_19 = arith.constant 0 : index
    %c0_20 = arith.constant 0 : index
    %37 = vector.load %arg14[%c0_19, %c0_20] : memref<16x32xf32, #tpu.memory_space<vmem>>, vector<16x32xf32>
    %cst_21 = arith.constant dense<0.000000e+00> : vector<8x32xf32>
    %38 = tpu.matmul %33, %37, %cst_21 {dimension_numbers = #tpu.dot_dimension_numbers<[1], [0], [0], [1], [0, 0, 1, 1], [], []>} : vector<8x16xf32>, vector<16x32xf32>, vector<8x32xf32> -> vector<8x32xf32>
    %c0_22 = arith.constant 0 : index
    %c0_23 = arith.constant 0 : index
    %39 = vector.load %arg4[%c0_22, %c0_23] : memref<24x18xf32, #tpu.memory_space<vmem>>, vector<24x18xf32>
    %cst_24 = arith.constant dense<0.000000e+00> : vector<24x32xf32>
    %40 = tpu.matmul %39, %36, %cst_24 {dimension_numbers = #tpu.dot_dimension_numbers<[1], [0], [0], [1], [0, 0, 1, 1], [], []>} : vector<24x18xf32>, vector<18x32xf32>, vector<24x32xf32> -> vector<24x32xf32>
    %c0_25 = arith.constant 0 : index
    %c0_26 = arith.constant 0 : index
    %41 = vector.load %arg5[%c0_25, %c0_26] : memref<24x8xf32, #tpu.memory_space<vmem>>, vector<24x8xf32>
    %cst_27 = arith.constant dense<0.000000e+00> : vector<24x32xf32>
    %42 = tpu.matmul %41, %38, %cst_27 {dimension_numbers = #tpu.dot_dimension_numbers<[1], [0], [0], [1], [0, 0, 1, 1], [], []>} : vector<24x8xf32>, vector<8x32xf32>, vector<24x32xf32> -> vector<24x32xf32>
    %43 = arith.addf %40, %42 : vector<24x32xf32>
    %c0_28 = arith.constant 0 : index
    %c0_29 = arith.constant 0 : index
    %44 = vector.load %arg9[%c0_28, %c0_29] : memref<24x32xf32, #tpu.memory_space<vmem>>, vector<24x32xf32>
    %45 = arith.addf %43, %44 : vector<24x32xf32>
    %c0_30 = arith.constant 0 : index
    %c0_31 = arith.constant 0 : index
    %46 = vector.load %arg15[%c0_30, %c0_31] : memref<32x32xf32, #tpu.memory_space<vmem>>, vector<32x32xf32>
    %cst_32 = arith.constant dense<0.000000e+00> : vector<24x32xf32>
    %47 = tpu.matmul %45, %46, %cst_32 {dimension_numbers = #tpu.dot_dimension_numbers<[1], [0], [0], [1], [0, 0, 1, 1], [], []>} : vector<24x32xf32>, vector<32x32xf32>, vector<24x32xf32> -> vector<24x32xf32>
    %c0_33 = arith.constant 0 : index
    %c0_34 = arith.constant 0 : index
    %48 = vector.load %arg16[%c0_33, %c0_34] : memref<32x32xf32, #tpu.memory_space<vmem>>, vector<32x32xf32>
    %cst_35 = arith.constant dense<0.000000e+00> : vector<24x32xf32>
    %49 = tpu.matmul %45, %48, %cst_35 {dimension_numbers = #tpu.dot_dimension_numbers<[1], [0], [0], [1], [0, 0, 1, 1], [], []>} : vector<24x32xf32>, vector<32x32xf32>, vector<24x32xf32> -> vector<24x32xf32>
    %c0_36 = arith.constant 0 : index
    %c0_37 = arith.constant 0 : index
    %50 = vector.load %arg17[%c0_36, %c0_37] : memref<32x32xf32, #tpu.memory_space<vmem>>, vector<32x32xf32>
    %cst_38 = arith.constant dense<0.000000e+00> : vector<24x32xf32>
    %51 = tpu.matmul %45, %50, %cst_38 {dimension_numbers = #tpu.dot_dimension_numbers<[1], [0], [0], [1], [0, 0, 1, 1], [], []>} : vector<24x32xf32>, vector<32x32xf32>, vector<24x32xf32> -> vector<24x32xf32>
    %cst_39 = arith.constant dense<0.000000e+00> : vector<24x24xf32>
    %52 = tpu.matmul %47, %49, %cst_39 {dimension_numbers = #tpu.dot_dimension_numbers<[1], [1], [0], [0], [0, 0, 1, 0], [], []>} : vector<24x32xf32>, vector<24x32xf32>, vector<24x24xf32> -> vector<24x24xf32>
    %cst_40 = arith.constant 0.176776692 : f32
    %53 = vector.broadcast %cst_40 : f32 to vector<24x24xf32>
    %54 = arith.mulf %52, %53 : vector<24x24xf32>
    %c0_41 = arith.constant 0 : index
    %c0_42 = arith.constant 0 : index
    %55 = vector.load %arg8[%c0_41, %c0_42] : memref<24x24xf32, #tpu.memory_space<vmem>>, vector<24x24xf32>
    %cst_43 = arith.constant 0.000000e+00 : f32
    %56 = vector.broadcast %cst_43 : f32 to vector<24x24xf32>
    %57 = arith.cmpf one, %55, %56 : vector<24x24xf32>
    %cst_44 = arith.constant -1.000000e+09 : f32
    %58 = vector.broadcast %cst_44 : f32 to vector<24x24xf32>
    %59 = arith.select %57, %54, %58 : vector<24x24xi1>, vector<24x24xf32>
    %cst_45 = arith.constant dense<0xFF800000> : vector<24xf32>
    %60 = vector.multi_reduction <maximumf>, %59, %cst_45 [1] : vector<24x24xf32> to vector<24xf32>
    %61 = vector.shape_cast %60 : vector<24xf32> to vector<24x1xf32>
    %62 = vector.broadcast %61 : vector<24x1xf32> to vector<24x24xf32>
    %63 = arith.subf %59, %62 : vector<24x24xf32>
    %64 = math.exp %63 : vector<24x24xf32>
    %cst_46 = arith.constant dense<0.000000e+00> : vector<24xf32>
    %65 = vector.multi_reduction <add>, %64, %cst_46 [1] : vector<24x24xf32> to vector<24xf32>
    %66 = vector.shape_cast %65 : vector<24xf32> to vector<24x1xf32>
    %67 = tpu.reciprocal %66 {approx = true} : vector<24x1xf32> -> vector<24x1xf32>
    %68 = vector.broadcast %67 : vector<24x1xf32> to vector<24x24xf32>
    %69 = arith.mulf %64, %68 : vector<24x24xf32>
    %cst_47 = arith.constant dense<0.000000e+00> : vector<24x32xf32>
    %70 = tpu.matmul %69, %51, %cst_47 {dimension_numbers = #tpu.dot_dimension_numbers<[1], [0], [0], [1], [0, 0, 1, 1], [], []>} : vector<24x24xf32>, vector<24x32xf32>, vector<24x32xf32> -> vector<24x32xf32>
    %c0_48 = arith.constant 0 : index
    %c0_49 = arith.constant 0 : index
    %71 = vector.load %arg18[%c0_48, %c0_49] : memref<32x32xf32, #tpu.memory_space<vmem>>, vector<32x32xf32>
    %cst_50 = arith.constant dense<0.000000e+00> : vector<24x32xf32>
    %72 = tpu.matmul %70, %71, %cst_50 {dimension_numbers = #tpu.dot_dimension_numbers<[1], [0], [0], [1], [0, 0, 1, 1], [], []>} : vector<24x32xf32>, vector<32x32xf32>, vector<24x32xf32> -> vector<24x32xf32>
    %73 = arith.addf %45, %72 : vector<24x32xf32>
    %c0_51 = arith.constant 0 : index
    %c0_52 = arith.constant 0 : index
    %74 = vector.load %arg19[%c0_51, %c0_52] : memref<32x128xf32, #tpu.memory_space<vmem>>, vector<32x128xf32>
    %cst_53 = arith.constant dense<0.000000e+00> : vector<24x128xf32>
    %75 = tpu.matmul %73, %74, %cst_53 {dimension_numbers = #tpu.dot_dimension_numbers<[1], [0], [0], [1], [0, 0, 1, 1], [], []>} : vector<24x32xf32>, vector<32x128xf32>, vector<24x128xf32> -> vector<24x128xf32>
    %c0_54 = arith.constant 0 : index
    %c0_55 = arith.constant 0 : index
    %76 = vector.load %arg20[%c0_54, %c0_55] : memref<1x128xf32, #tpu.memory_space<vmem>>, vector<1x128xf32>
    %77 = vector.broadcast %76 : vector<1x128xf32> to vector<24x128xf32>
    %78 = arith.addf %75, %77 : vector<24x128xf32>
    %79 = arith.mulf %78, %78 : vector<24x128xf32>
    %80 = arith.mulf %78, %79 : vector<24x128xf32>
    %cst_56 = arith.constant 4.471500e-02 : f32
    %81 = vector.broadcast %cst_56 : f32 to vector<24x128xf32>
    %82 = arith.mulf %81, %80 : vector<24x128xf32>
    %83 = arith.addf %78, %82 : vector<24x128xf32>
    %cst_57 = arith.constant 0.797884583 : f32
    %84 = vector.broadcast %cst_57 : f32 to vector<24x128xf32>
    %85 = arith.mulf %84, %83 : vector<24x128xf32>
    %86 = math.tanh %85 : vector<24x128xf32>
    %cst_58 = arith.constant 1.000000e+00 : f32
    %87 = vector.broadcast %cst_58 : f32 to vector<24x128xf32>
    %88 = arith.addf %87, %86 : vector<24x128xf32>
    %cst_59 = arith.constant 5.000000e-01 : f32
    %89 = vector.broadcast %cst_59 : f32 to vector<24x128xf32>
    %90 = arith.mulf %89, %88 : vector<24x128xf32>
    %91 = arith.mulf %78, %90 : vector<24x128xf32>
    %c0_60 = arith.constant 0 : index
    %c0_61 = arith.constant 0 : index
    %92 = vector.load %arg21[%c0_60, %c0_61] : memref<128x32xf32, #tpu.memory_space<vmem>>, vector<128x32xf32>
    %cst_62 = arith.constant dense<0.000000e+00> : vector<24x32xf32>
    %93 = tpu.matmul %91, %92, %cst_62 {dimension_numbers = #tpu.dot_dimension_numbers<[1], [0], [0], [1], [0, 0, 1, 1], [], []>} : vector<24x128xf32>, vector<128x32xf32>, vector<24x32xf32> -> vector<24x32xf32>
    %94 = arith.addf %73, %93 : vector<24x32xf32>
    %c0_63 = arith.constant 0 : index
    %c0_64 = arith.constant 0 : index
    %95 = vector.load %arg22[%c0_63, %c0_64] : memref<1x32xf32, #tpu.memory_space<vmem>>, vector<1x32xf32>
    %96 = vector.broadcast %95 : vector<1x32xf32> to vector<24x32xf32>
    %97 = arith.addf %94, %96 : vector<24x32xf32>
    %cst_65 = arith.constant dense<0.000000e+00> : vector<24xf32>
    %98 = vector.multi_reduction <add>, %97, %cst_65 [1] : vector<24x32xf32> to vector<24xf32>
    %99 = vector.shape_cast %98 : vector<24xf32> to vector<24x1xf32>
    %cst_66 = arith.constant 3.200000e+01 : f32
    %100 = vector.broadcast %cst_66 : f32 to vector<24x1xf32>
    %101 = arith.divf %99, %100 : vector<24x1xf32>
    %102 = vector.broadcast %101 : vector<24x1xf32> to vector<24x32xf32>
    %103 = arith.subf %97, %102 : vector<24x32xf32>
    %104 = arith.mulf %103, %103 : vector<24x32xf32>
    %cst_67 = arith.constant dense<0.000000e+00> : vector<24xf32>
    %105 = vector.multi_reduction <add>, %104, %cst_67 [1] : vector<24x32xf32> to vector<24xf32>
    %106 = vector.shape_cast %105 : vector<24xf32> to vector<24x1xf32>
    %cst_68 = arith.constant 3.200000e+01 : f32
    %107 = vector.broadcast %cst_68 : f32 to vector<24x1xf32>
    %108 = arith.divf %106, %107 : vector<24x1xf32>
    %109 = vector.broadcast %101 : vector<24x1xf32> to vector<24x32xf32>
    %110 = arith.subf %97, %109 : vector<24x32xf32>
    %cst_69 = arith.constant 9.99999974E-6 : f32
    %111 = vector.broadcast %cst_69 : f32 to vector<24x1xf32>
    %112 = arith.addf %108, %111 : vector<24x1xf32>
    %113 = math.rsqrt %112 : vector<24x1xf32>
    %114 = vector.broadcast %113 : vector<24x1xf32> to vector<24x32xf32>
    %115 = arith.mulf %110, %114 : vector<24x32xf32>
    %c0_70 = arith.constant 0 : index
    %c0_71 = arith.constant 0 : index
    %116 = vector.load %arg23[%c0_70, %c0_71] : memref<1x32xf32, #tpu.memory_space<vmem>>, vector<1x32xf32>
    %117 = vector.broadcast %116 : vector<1x32xf32> to vector<24x32xf32>
    %118 = arith.mulf %115, %117 : vector<24x32xf32>
    %c0_72 = arith.constant 0 : index
    %c0_73 = arith.constant 0 : index
    %119 = vector.load %arg24[%c0_72, %c0_73] : memref<1x32xf32, #tpu.memory_space<vmem>>, vector<1x32xf32>
    %120 = vector.broadcast %119 : vector<1x32xf32> to vector<24x32xf32>
    %121 = arith.addf %118, %120 : vector<24x32xf32>
    %c0_74 = arith.constant 0 : index
    %c0_75 = arith.constant 0 : index
    %122 = vector.load %arg25[%c0_74, %c0_75] : memref<32x128xf32, #tpu.memory_space<vmem>>, vector<32x128xf32>
    %cst_76 = arith.constant dense<0.000000e+00> : vector<24x128xf32>
    %123 = tpu.matmul %121, %122, %cst_76 {dimension_numbers = #tpu.dot_dimension_numbers<[1], [0], [0], [1], [0, 0, 1, 1], [], []>} : vector<24x32xf32>, vector<32x128xf32>, vector<24x128xf32> -> vector<24x128xf32>
    %c0_77 = arith.constant 0 : index
    %c0_78 = arith.constant 0 : index
    %124 = vector.load %arg26[%c0_77, %c0_78] : memref<1x128xf32, #tpu.memory_space<vmem>>, vector<1x128xf32>
    %125 = vector.broadcast %124 : vector<1x128xf32> to vector<24x128xf32>
    %126 = arith.addf %123, %125 : vector<24x128xf32>
    %cst_79 = arith.constant dense<0xFF800000> : vector<24xf32>
    %127 = vector.multi_reduction <maximumf>, %126, %cst_79 [1] : vector<24x128xf32> to vector<24xf32>
    %128 = vector.shape_cast %127 : vector<24xf32> to vector<24x1xf32>
    %129 = vector.broadcast %128 : vector<24x1xf32> to vector<24x128xf32>
    %130 = arith.subf %126, %129 : vector<24x128xf32>
    %131 = math.exp %130 : vector<24x128xf32>
    %cst_80 = arith.constant dense<0.000000e+00> : vector<24xf32>
    %132 = vector.multi_reduction <add>, %131, %cst_80 [1] : vector<24x128xf32> to vector<24xf32>
    %133 = vector.shape_cast %132 : vector<24xf32> to vector<24x1xf32>
    %134 = math.log %133 : vector<24x1xf32>
    %135 = arith.addf %134, %128 : vector<24x1xf32>
    %136 = tpu.iota {dimensions = array<i32: 1>} : vector<8x128xi32>
    %c32_i32 = arith.constant 32 : i32
    %137 = vector.broadcast %c32_i32 : i32 to vector<8x1xi32>
    %138 = arith.addi %29, %137 : vector<8x1xi32>
    %139 = vector.broadcast %138 : vector<8x1xi32> to vector<8x128xi32>
    %140 = arith.cmpi eq, %136, %139 : vector<8x128xi32>
    %141 = arith.extui %140 : vector<8x128xi1> to vector<8x128xi32>
    %142 = arith.sitofp %141 : vector<8x128xi32> to vector<8x128xf32>
    %c0_81 = arith.constant 0 : index
    %c0_82 = arith.constant 0 : index
    %143 = vector.load %arg6[%c0_81, %c0_82] : memref<24x16xf32, #tpu.memory_space<vmem>>, vector<24x16xf32>
    %c0_83 = arith.constant 0 : index
    %c0_84 = arith.constant 0 : index
    %144 = vector.load %arg3[%c0_83, %c0_84] : memref<16x128xf32, #tpu.memory_space<vmem>>, vector<16x128xf32>
    %cst_85 = arith.constant dense<0.000000e+00> : vector<24x128xf32>
    %145 = tpu.matmul %143, %144, %cst_85 {dimension_numbers = #tpu.dot_dimension_numbers<[1], [0], [0], [1], [0, 0, 1, 1], [], []>} : vector<24x16xf32>, vector<16x128xf32>, vector<24x128xf32> -> vector<24x128xf32>
    %c0_86 = arith.constant 0 : index
    %c0_87 = arith.constant 0 : index
    %146 = vector.load %arg7[%c0_86, %c0_87] : memref<24x8xf32, #tpu.memory_space<vmem>>, vector<24x8xf32>
    %cst_88 = arith.constant dense<0.000000e+00> : vector<24x128xf32>
    %147 = tpu.matmul %146, %142, %cst_88 {dimension_numbers = #tpu.dot_dimension_numbers<[1], [0], [0], [1], [0, 0, 1, 1], [], []>} : vector<24x8xf32>, vector<8x128xf32>, vector<24x128xf32> -> vector<24x128xf32>
    %148 = arith.addf %145, %147 : vector<24x128xf32>
    %149 = arith.mulf %126, %148 : vector<24x128xf32>
    %cst_89 = arith.constant dense<0.000000e+00> : vector<24xf32>
    %150 = vector.multi_reduction <add>, %149, %cst_89 [1] : vector<24x128xf32> to vector<24xf32>
    %151 = vector.shape_cast %150 : vector<24xf32> to vector<24x1xf32>
    %152 = arith.subf %135, %151 : vector<24x1xf32>
    %c0_90 = arith.constant 0 : index
    %c0_91 = arith.constant 0 : index
    %153 = vector.load %arg6[%c0_90, %c0_91] : memref<24x16xf32, #tpu.memory_space<vmem>>, vector<24x16xf32>
    %cst_92 = arith.constant dense<0.000000e+00> : vector<24xf32>
    %154 = vector.multi_reduction <add>, %153, %cst_92 [1] : vector<24x16xf32> to vector<24xf32>
    %155 = vector.shape_cast %154 : vector<24xf32> to vector<24x1xf32>
    %c0_93 = arith.constant 0 : index
    %c0_94 = arith.constant 0 : index
    %156 = vector.load %arg7[%c0_93, %c0_94] : memref<24x8xf32, #tpu.memory_space<vmem>>, vector<24x8xf32>
    %cst_95 = arith.constant dense<0.000000e+00> : vector<24xf32>
    %157 = vector.multi_reduction <add>, %156, %cst_95 [1] : vector<24x8xf32> to vector<24xf32>
    %158 = vector.shape_cast %157 : vector<24xf32> to vector<24x1xf32>
    %159 = arith.mulf %152, %155 : vector<24x1xf32>
    %160 = vector.shape_cast %159 : vector<24x1xf32> to vector<1x24x1xf32>
    %cst_96 = arith.constant dense<0.000000e+00> : vector<1xf32>
    %161 = vector.multi_reduction <add>, %160, %cst_96 [1, 2] : vector<1x24x1xf32> to vector<1xf32>
    %162 = vector.shape_cast %161 : vector<1xf32> to vector<1x1x1xf32>
    %163 = vector.extract %162[0, 0, 0] : f32 from vector<1x1x1xf32>
    %164 = arith.mulf %152, %158 : vector<24x1xf32>
    %165 = vector.shape_cast %164 : vector<24x1xf32> to vector<1x24x1xf32>
    %cst_97 = arith.constant dense<0.000000e+00> : vector<1xf32>
    %166 = vector.multi_reduction <add>, %165, %cst_97 [1, 2] : vector<1x24x1xf32> to vector<1xf32>
    %167 = vector.shape_cast %166 : vector<1xf32> to vector<1x1x1xf32>
    %168 = vector.extract %167[0, 0, 0] : f32 from vector<1x1x1xf32>
    %169 = tpu.iota {dimensions = array<i32: 0>} : vector<8x128xi32>
    %170 = tpu.iota {dimensions = array<i32: 1>} : vector<8x128xi32>
    %c0_i32 = arith.constant 0 : i32
    %171 = vector.broadcast %c0_i32 : i32 to vector<8x128xi32>
    %172 = arith.cmpi eq, %169, %171 : vector<8x128xi32>
    %c0_i32_98 = arith.constant 0 : i32
    %173 = vector.broadcast %c0_i32_98 : i32 to vector<8x128xi32>
    %174 = arith.cmpi eq, %170, %173 : vector<8x128xi32>
    %175 = arith.andi %172, %174 : vector<8x128xi1>
    %cst_99 = arith.constant 0.000000e+00 : f32
    %176 = vector.broadcast %163 : f32 to vector<8x128xf32>
    %177 = vector.broadcast %cst_99 : f32 to vector<8x128xf32>
    %178 = arith.select %175, %176, %177 : vector<8x128xi1>, vector<8x128xf32>
    %c0_i32_100 = arith.constant 0 : i32
    %179 = vector.broadcast %c0_i32_100 : i32 to vector<8x128xi32>
    %180 = arith.cmpi eq, %169, %179 : vector<8x128xi32>
    %c1_i32 = arith.constant 1 : i32
    %181 = vector.broadcast %c1_i32 : i32 to vector<8x128xi32>
    %182 = arith.cmpi eq, %170, %181 : vector<8x128xi32>
    %183 = arith.andi %180, %182 : vector<8x128xi1>
    %cst_101 = arith.constant 0.000000e+00 : f32
    %184 = vector.broadcast %168 : f32 to vector<8x128xf32>
    %185 = vector.broadcast %cst_101 : f32 to vector<8x128xf32>
    %186 = arith.select %183, %184, %185 : vector<8x128xi1>, vector<8x128xf32>
    %187 = arith.addf %178, %186 : vector<8x128xf32>
    %c0_102 = arith.constant 0 : index
    %c0_103 = arith.constant 0 : index
    %188 = vector.load %arg27[%c0_102, %c0_103] : memref<8x128xf32, #tpu.memory_space<vmem>>, vector<8x128xf32>
    tpu.vector_store %arg27[%c0_102, %c0_103], %187 {strides = array<i32>} : memref<8x128xf32, #tpu.memory_space<vmem>>, vector<8x128xf32>,
    return
  }
  func.func @transform_0(%arg0: i32) -> (i32, i32) {
    %c0_i32 = arith.constant 0 : i32
    %c0_i32_0 = arith.constant 0 : i32
    return %arg0, %c0_i32 : i32, i32
  }
  func.func @transform_1(%arg0: i32) -> (i32, i32) {
    %c0_i32 = arith.constant 0 : i32
    %c0_i32_0 = arith.constant 0 : i32
    return %arg0, %c0_i32 : i32, i32
  }
  func.func @transform_2(%arg0: i32) -> (i32, i32) {
    %c0_i32 = arith.constant 0 : i32
    %c0_i32_0 = arith.constant 0 : i32
    return %arg0, %c0_i32 : i32, i32
  }
  func.func @transform_3(%arg0: i32) -> (i32, i32) {
    %c0_i32 = arith.constant 0 : i32
    %c0_i32_0 = arith.constant 0 : i32
    %c0_i32_1 = arith.constant 0 : i32
    return %c0_i32, %c0_i32_0 : i32, i32
  }
  func.func @transform_4(%arg0: i32) -> (i32, i32) {
    %c0_i32 = arith.constant 0 : i32
    %c0_i32_0 = arith.constant 0 : i32
    %c0_i32_1 = arith.constant 0 : i32
    return %c0_i32, %c0_i32_0 : i32, i32
  }
  func.func @transform_5(%arg0: i32) -> (i32, i32) {
    %c0_i32 = arith.constant 0 : i32
    %c0_i32_0 = arith.constant 0 : i32
    %c0_i32_1 = arith.constant 0 : i32
    return %c0_i32, %c0_i32_0 : i32, i32
  }
  func.func @transform_6(%arg0: i32) -> (i32, i32) {
    %c0_i32 = arith.constant 0 : i32
    %c0_i32_0 = arith.constant 0 : i32
    %c0_i32_1 = arith.constant 0 : i32
    return %c0_i32, %c0_i32_0 : i32, i32
  }
  func.func @transform_7(%arg0: i32) -> (i32, i32) {
    %c0_i32 = arith.constant 0 : i32
    %c0_i32_0 = arith.constant 0 : i32
    %c0_i32_1 = arith.constant 0 : i32
    return %c0_i32, %c0_i32_0 : i32, i32
  }
  func.func @transform_8(%arg0: i32) -> (i32, i32) {
    %c0_i32 = arith.constant 0 : i32
    %c0_i32_0 = arith.constant 0 : i32
    %c0_i32_1 = arith.constant 0 : i32
    return %c0_i32, %c0_i32_0 : i32, i32
  }
  func.func @transform_9(%arg0: i32) -> (i32, i32) {
    %c0_i32 = arith.constant 0 : i32
    %c0_i32_0 = arith.constant 0 : i32
    %c0_i32_1 = arith.constant 0 : i32
    return %c0_i32, %c0_i32_0 : i32, i32
  }
  func.func @transform_10(%arg0: i32) -> (i32, i32) {
    %c0_i32 = arith.constant 0 : i32
    %c0_i32_0 = arith.constant 0 : i32
    %c0_i32_1 = arith.constant 0 : i32
    return %c0_i32, %c0_i32_0 : i32, i32
  }
  func.func @transform_11(%arg0: i32) -> (i32, i32) {
    %c0_i32 = arith.constant 0 : i32
    %c0_i32_0 = arith.constant 0 : i32
    %c0_i32_1 = arith.constant 0 : i32
    return %c0_i32, %c0_i32_0 : i32, i32
  }
  func.func @transform_12(%arg0: i32) -> (i32, i32) {
    %c0_i32 = arith.constant 0 : i32
    %c0_i32_0 = arith.constant 0 : i32
    %c0_i32_1 = arith.constant 0 : i32
    return %c0_i32, %c0_i32_0 : i32, i32
  }
  func.func @transform_13(%arg0: i32) -> (i32, i32) {
    %c0_i32 = arith.constant 0 : i32
    %c0_i32_0 = arith.constant 0 : i32
    %c0_i32_1 = arith.constant 0 : i32
    return %c0_i32, %c0_i32_0 : i32, i32
  }
  func.func @transform_14(%arg0: i32) -> (i32, i32) {
    %c0_i32 = arith.constant 0 : i32
    %c0_i32_0 = arith.constant 0 : i32
    %c0_i32_1 = arith.constant 0 : i32
    return %c0_i32, %c0_i32_0 : i32, i32
  }
  func.func @transform_15(%arg0: i32) -> (i32, i32) {
    %c0_i32 = arith.constant 0 : i32
    %c0_i32_0 = arith.constant 0 : i32
    %c0_i32_1 = arith.constant 0 : i32
    return %c0_i32, %c0_i32_0 : i32, i32
  }
  func.func @transform_16(%arg0: i32) -> (i32, i32) {
    %c0_i32 = arith.constant 0 : i32
    %c0_i32_0 = arith.constant 0 : i32
    %c0_i32_1 = arith.constant 0 : i32
    return %c0_i32, %c0_i32_0 : i32, i32
  }
  func.func @transform_17(%arg0: i32) -> (i32, i32) {
    %c0_i32 = arith.constant 0 : i32
    %c0_i32_0 = arith.constant 0 : i32
    %c0_i32_1 = arith.constant 0 : i32
    return %c0_i32, %c0_i32_0 : i32, i32
  }
  func.func @transform_18(%arg0: i32) -> (i32, i32) {
    %c0_i32 = arith.constant 0 : i32
    %c0_i32_0 = arith.constant 0 : i32
    %c0_i32_1 = arith.constant 0 : i32
    return %c0_i32, %c0_i32_0 : i32, i32
  }
  func.func @transform_19(%arg0: i32) -> (i32, i32) {
    %c0_i32 = arith.constant 0 : i32
    %c0_i32_0 = arith.constant 0 : i32
    %c0_i32_1 = arith.constant 0 : i32
    return %c0_i32, %c0_i32_0 : i32, i32
  }
  func.func @transform_20(%arg0: i32) -> (i32, i32) {
    %c0_i32 = arith.constant 0 : i32
    %c0_i32_0 = arith.constant 0 : i32
    %c0_i32_1 = arith.constant 0 : i32
    return %c0_i32, %c0_i32_0 : i32, i32
  }
  func.func @transform_21(%arg0: i32) -> (i32, i32) {
    %c0_i32 = arith.constant 0 : i32
    %c0_i32_0 = arith.constant 0 : i32
    %c0_i32_1 = arith.constant 0 : i32
    return %c0_i32, %c0_i32_0 : i32, i32
  }
  func.func @transform_22(%arg0: i32) -> (i32, i32) {
    %c0_i32 = arith.constant 0 : i32
    %c0_i32_0 = arith.constant 0 : i32
    %c0_i32_1 = arith.constant 0 : i32
    return %c0_i32, %c0_i32_0 : i32, i32
  }
  func.func @transform_23(%arg0: i32) -> (i32, i32) {
    %c0_i32 = arith.constant 0 : i32
    %c0_i32_0 = arith.constant 0 : i32
    %c0_i32_1 = arith.constant 0 : i32
    return %c0_i32, %c0_i32_0 : i32, i32
  }
  func.func @transform_24(%arg0: i32) -> (i32, i32) {
    %c0_i32 = arith.constant 0 : i32
    %c0_i32_0 = arith.constant 0 : i32
    %c0_i32_1 = arith.constant 0 : i32
    return %c0_i32, %c0_i32_0 : i32, i32
  }
  func.func @transform_25(%arg0: i32) -> (i32, i32) {
    %c0_i32 = arith.constant 0 : i32
    %c0_i32_0 = arith.constant 0 : i32
    %c0_i32_1 = arith.constant 0 : i32
    return %c0_i32, %c0_i32_0 : i32, i32
  }
  func.func @transform_26(%arg0: i32) -> (i32, i32) {
    %c0_i32 = arith.constant 0 : i32
    %c0_i32_0 = arith.constant 0 : i32
    return %arg0, %c0_i32 : i32, i32
  }
}

</mosaic_0001>

<bundles_post_ra>
// kernel: tile.9
= control target key start
LH: loop header
LB: loop body
LE: loop exit
PB: predicated region body
PF: predicated region fallthrough
CT: control target
= control target key end

     0   :  { %vm3_vm0 = vcmask 261120   ;;  %s60_s0 = inlined_call_operand.vmem [shape: f32[2,12,32], index: 0, kind: input, shape index: {}]   ;;  %s61_s1 = inlined_call_operand.vmem [shape: f32[24,32], index: 1, kind: output, shape index: {}]  }
   0x1   :  { %v2_v0 = vld [vmem:[%s60_s0] sm:$0xff]   ;;  %v20_v1 = vld [vmem:[%s60_s0 + $0x8] sm:$0xf]   ;;  %v22_v2 = vld [vmem:[%s60_s0 + $0x10] sm:$0xff]  }
   0x2   :  { %4 = vst.msk [vmem:[%s61_s1] sm:$0xff] %vm3_vm0, %v2_v0   ;;  %21 = vst.msk [vmem:[%s61_s1 + $0x8] sm:$0xf] %vm3_vm0, %v20_v1   ;;  %v24_v3 = vld [vmem:[%s60_s0 + $0x18] sm:$0xf]  }
   0x3   :  { %23 = vst.msk [vmem:[%s61_s1 + $0xc] sm:$0xff] %vm3_vm0, %v22_v2   ;;  %25 = vst.msk [vmem:[%s61_s1 + $0x14] sm:$0xf] %vm3_vm0, %v24_v3  }

// kernel: eq.1
= control target key start
LH: loop header
LB: loop body
LE: loop exit
PB: predicated region body
PF: predicated region fallthrough
CT: control target
= control target key end

     0   :  { %vm8_vm0 = vcmask 72704   ;;  %vm14_vm1 = vcmask 146504   ;;  %s42_s0 = inlined_call_operand.vmem [shape: s32[2,9], index: 0, kind: input, shape index: {}]   ;;  %s43_s1 = inlined_call_operand.vmem [shape: s32[18], index: 1, kind: output, shape index: {}]  }
   0x1   :  { %v5_v0 = vld [vmem:[%s42_s0] sm:$0x3]  ;;  %s25_s0 = smov 9  }
   0x2   :  { %6 = vst [vmem:[#allocation1] sm:$0x3] %v5_v0 }
   0x9   :  { %v11_v1 = vld [vmem:[#allocation1 + $0x1] sm:$0x1]   ;;  %v7_v2 = vld [vmem:[#allocation1] sm:$0x1]  }
   0xa   :  { %12 = vrot.lane.b32.xlu0 %v11_v1, %s25_s0  ;;  %9 = vst.msk [vmem:[#allocation0] sm:$0x1] %vm8_vm0, %v7_v2  }
  0x7c   :  { %v13_v3 = vpop.permute.xlu0 %12  }
  0x7d   :  { %15 = vst.msk [vmem:[#allocation0] sm:$0x1] %vm14_vm1, %v13_v3  }
  0x84   :  { %v20_v4 = vld [vmem:[#allocation0] sm:$0x1] }
  0x85   :  { %23 = vst [vmem:[%s43_s1] sm:$0x1] %v20_v4 }

// kernel: eq.15
= control target key start
LH: loop header
LB: loop body
LE: loop exit
PB: predicated region body
PF: predicated region fallthrough
CT: control target
= control target key end

     0   :  { %vm8_vm0 = vcmask 64512   ;;  %vm14_vm1 = vcmask 130112   ;;  %s42_s0 = inlined_call_operand.vmem [shape: s32[2,8], index: 0, kind: input, shape index: {}]   ;;  %s43_s1 = inlined_call_operand.vmem [shape: s32[16], index: 1, kind: output, shape index: {}]  }
   0x1   :  { %v5_v0 = vld [vmem:[%s42_s0] sm:$0x3]  ;;  %s25_s0 = smov 8  }
   0x2   :  { %6 = vst [vmem:[#allocation1] sm:$0x3] %v5_v0 }
   0x9   :  { %v11_v1 = vld [vmem:[#allocation1 + $0x1] sm:$0x1]   ;;  %v7_v2 = vld [vmem:[#allocation1] sm:$0x1]  }
   0xa   :  { %12 = vrot.lane.b32.xlu0 %v11_v1, %s25_s0  ;;  %9 = vst.msk [vmem:[#allocation0] sm:$0x1] %vm8_vm0, %v7_v2  }
  0x7c   :  { %v13_v3 = vpop.permute.xlu0 %12  }
  0x7d   :  { %15 = vst.msk [vmem:[#allocation0] sm:$0x1] %vm14_vm1, %v13_v3  }
  0x84   :  { %v20_v4 = vld [vmem:[#allocation0] sm:$0x1] }
  0x85   :  { %23 = vst [vmem:[%s43_s1] sm:$0x1] %v20_v4 }

// kernel: dalle_module_forward.1
= control target key start
LH: loop header
LB: loop body
LE: loop exit
PB: predicated region body
PF: predicated region fallthrough
CT: control target
= control target key end

     0   :  { %v2423_v0 = vmov 0.0   ;;  %vm116_vm0 = vcmask 523264   ;;  %vm2424_vm1 = vmmov 0   ;;  %vm203_vm2 = vcmask 261120   ;;  %s3188_s9 = inlined_call_operand.vmem [shape: f32[192,32], index: 9, kind: input, shape index: {}]   ;;  %s3189_s0 = inlined_call_operand.vmem [shape: f32[8,192], index: 0, kind: input, shape index: {}]   ;;  %s3190_s11 = inlined_call_operand.vmem [shape: f32[32,16], index: 11, kind: input, shape index: {}]   ;;  %s3191_s10 = inlined_call_operand.vmem [shape: f32[1,32], index: 10, kind: input, shape index: {}]   ;;  %s3192_s12 = inlined_call_operand.vmem [shape: f32[32,32], index: 12, kind: input, shape index: {}]   ;;  %s3193_s1 = inlined_call_operand.vmem [shape: f32[18,32], index: 1, kind: input, shape index: {}]   ;;  %s3194_s13 = inlined_call_operand.vmem [shape: f32[16,32], index: 13, kind: input, shape index: {}]   ;;  %s3195_s4 = inlined_call_operand.vmem [shape: f32[24,8], index: 4, kind: input, shape index: {}]   ;;  %s3196_s3 = inlined_call_operand.vmem [shape: f32[24,18], index: 3, kind: input, shape index: {}]   ;;  %s3197_s14 = inlined_call_operand.vmem [shape: f32[32,32], index: 14, kind: input, shape index: {}]   ;;  %s3198_s15 = inlined_call_operand.vmem [shape: f32[32,32], index: 15, kind: input, shape index: {}]   ;;  %s3199_s8 = inlined_call_operand.vmem [shape: f32[24,32], index: 8, kind: input, shape index: {}]   ;;  %s3200_s16 = inlined_call_operand.vmem [shape: f32[32,32], index: 16, kind: input, shape index: {}]   ;;  %s3201_s7 = inlined_call_operand.vmem [shape: f32[24,24], index: 7, kind: input, shape index: {}]   ;;  %s3202_s17 = inlined_call_operand.vmem [shape: f32[32,32], index: 17, kind: input, shape index: {}]   ;;  %s3203_s18 = inlined_call_operand.vmem [shape: f32[32,128], index: 18, kind: input, shape index: {}]   ;;  %s3204_s20 = inlined_call_operand.vmem [shape: f32[128,32], index: 20, kind: input, shape index: {}]   ;;  %s3205_s19 = inlined_call_operand.vmem [shape: f32[1,128], index: 19, kind: input, shape index: {}]   ;;  %s3206_s21 = inlined_call_operand.vmem [shape: f32[1,32], index: 21, kind: input, shape index: {}]   ;;  %s3207_s24 = inlined_call_operand.vmem [shape: f32[32,128], index: 24, kind: input, shape index: {}]   ;;  %s3208_s2 = inlined_call_operand.vmem [shape: f32[16,128], index: 2, kind: input, shape index: {}]   ;;  %s3209_s5 = inlined_call_operand.vmem [shape: f32[24,16], index: 5, kind: input, shape index: {}]   ;;  %s3210_s22 = inlined_call_operand.vmem [shape: f32[1,32], index: 22, kind: input, shape index: {}]   ;;  %s3211_s23 = inlined_call_operand.vmem [shape: f32[1,32], index: 23, kind: input, shape index: {}]   ;;  %s3212_s6 = inlined_call_operand.vmem [shape: f32[24,8], index: 6, kind: input, shape index: {}]   ;;  %s3213_s25 = inlined_call_operand.vmem [shape: f32[1,128], index: 25, kind: input, shape index: {}]   ;;  %s3214_s26 = inlined_call_operand.vmem [shape: f32[8,128], index: 26, kind: output, shape index: {}]  }
   0x1   :  { %3225 = sst [smem:[#allocation2_spill]] %s3188_s9  ;;  %120 = vmatprep.subr.mxu0 %v2423_v0  ;;  %2120 = vmatprep.subr.mxu1 %v2423_v0  ;;  %vm279_vm3 = vcmask 130048   ;;  %v277_v47 = vlaneseq  ;;  %vm480_vm7 = vcmask 64512   ;;  %vm580_vm8 = vcmask 1041408  }
   0x2   :  { %3226 = sst [smem:[#allocation3_spill]] %s3189_s0  ;;  %2128 = vmatprep.mubr.msk.f32.mxu1 %vm2424_vm1, %v2423_v0  ;;  %vm570_vm9 = vcmask 146432   ;;  %vm1041_vm11 = vcmask 195584   ;;  %vm1909_vm15 = vcmask 7168  }
   0x3   :  { %3227 = sst [smem:[#allocation4_spill]] %s3190_s11  ;;  %v2693_v48 = vand.u32 127, %v277_v47 }
   0x4   :  { %3228 = sst [smem:[#allocation5_spill]] %s3191_s10 }
   0x5   :  { %3229 = sst [smem:[#allocation6_spill]] %s3192_s12 }
   0x6   :  { %3230 = sst [smem:[#allocation7_spill]] %s3193_s1 }
   0x7   :  { %3231 = sst [smem:[#allocation8_spill]] %s3194_s13 }
   0x8   :  { %3232 = sst [smem:[#allocation9_spill]] %s3195_s4 }
   0x9   :  { %3233 = sst [smem:[#allocation10_spill]] %s3196_s3 }
   0xa   :  { %3234 = sst [smem:[#allocation11_spill]] %s3197_s14 }
   0xb   :  { %3235 = sst [smem:[#allocation12_spill]] %s3198_s15 }
   0xc   :  { %s3236_s10 = sld [smem:[#allocation2_spill]] }
   0xd   :  { %s3237_s4 = sld [smem:[#allocation3_spill]] }
   0xe   :  { %s3238_s28 = sld [smem:[#allocation4_spill]] }
   0xf   :  { %s3239_s9 = sld [smem:[#allocation5_spill]] }
  0x10   :  { %s3240_s13 = sld [smem:[#allocation6_spill]] }
  0x11   :  { %s3241_s1 = sld [smem:[#allocation7_spill]] }
  0x12   :  { %v100_v1 = vld [vmem:[%s3236_s10 + $0x78] sm:$0xff]  ;;  %v99_v2 = vld [vmem:[%s3236_s10 + $0x70] sm:$0xff]  ;;  %v98_v3 = vld [vmem:[%s3236_s10 + $0x68] sm:$0xff]  ;;  %s3244_s11 = sld [smem:[#allocation10_spill]] }
  0x13   :  { %121 = vmatpush1.msra.mxu0 %v100_v1  ;;  %v97_v4 = vld [vmem:[%s3236_s10 + $0x60] sm:$0xff]  ;;  %v96_v5 = vld [vmem:[%s3236_s10 + $0x58] sm:$0xff]  ;;  %v95_v6 = vld [vmem:[%s3236_s10 + $0x50] sm:$0xff]  ;;  %s3245_s12 = sld [smem:[#allocation11_spill]] }
  0x14   :  { %122 = vmatprep.subr.mxu0 %v2423_v0  ;;  %v84_v7 = vld [vmem:[%s3237_s4 + $0x8] sm:$0xff]  ;;  %v93_v9 = vld [vmem:[%s3236_s10 + $0x40] sm:$0xff]  ;;  %v92_v10 = vld [vmem:[%s3236_s10 + $0x38] sm:$0xff]  ;;  %s3246_s29 = sld [smem:[#allocation12_spill]] }
  0x15   :  { %123 = vmatpush1.msra.mxu0 %v99_v2  ;;  %1959 = vmatprep.mubr.msk.f32.mxu0 %vm116_vm0, %v84_v7  ;;  %v94_v8 = vld [vmem:[%s3236_s10 + $0x48] sm:$0xff]  ;;  %v91_v11 = vld [vmem:[%s3236_s10 + $0x30] sm:$0xff]  ;;  %v89_v13 = vld [vmem:[%s3236_s10 + $0x20] sm:$0xff] }
  0x16   :  { %124 = vmatprep.subr.mxu0 %v2423_v0  ;;  %v90_v12 = vld [vmem:[%s3236_s10 + $0x28] sm:$0xff]  ;;  %v88_v14 = vld [vmem:[%s3236_s10 + $0x18] sm:$0xff]  ;;  %v87_v15 = vld [vmem:[%s3236_s10 + $0x10] sm:$0xff] }
  0x17   :  { %125 = vmatpush1.msra.mxu0 %v98_v3  ;;  %v86_v16 = vld [vmem:[%s3236_s10 + $0x8] sm:$0xff]  ;;  %v85_v17 = vld [vmem:[%s3236_s10] sm:$0xff]  ;;  %v108_v18 = vld [vmem:[%s3236_s10 + $0xb8] sm:$0xff] }
  0x18   :  { %126 = vmatprep.subr.mxu0 %v2423_v0  ;;  %v107_v19 = vld [vmem:[%s3236_s10 + $0xb0] sm:$0xff]  ;;  %v106_v20 = vld [vmem:[%s3236_s10 + $0xa8] sm:$0xff]  ;;  %v105_v21 = vld [vmem:[%s3236_s10 + $0xa0] sm:$0xff] }
  0x19   :  { %127 = vmatpush1.msra.mxu0 %v97_v4  ;;  %v104_v22 = vld [vmem:[%s3236_s10 + $0x98] sm:$0xff]  ;;  %v103_v23 = vld [vmem:[%s3236_s10 + $0x90] sm:$0xff]  ;;  %v102_v24 = vld [vmem:[%s3236_s10 + $0x88] sm:$0xff] }
  0x1a   :  { %128 = vmatprep.subr.mxu0 %v2423_v0  ;;  %v101_v25 = vld [vmem:[%s3236_s10 + $0x80] sm:$0xff]  ;;  %v202_v27 = vld [vmem:[%s3238_s28 + $0x18] sm:$0xff]  ;;  %v201_v28 = vld [vmem:[%s3238_s28 + $0x10] sm:$0xff]  ;;  %s3243_s10 = sld [smem:[#allocation9_spill]] }
  0x1b   :  { %129 = vmatpush1.msra.mxu0 %v96_v5  ;;  %v83_v26 = vld [vmem:[%s3237_s4] sm:$0xff]  ;;  %2121 = vmatpush3.msra.mxu1 %v202_v27  ;;  %v200_v29 = vld [vmem:[%s3238_s28 + $0x8] sm:$0xff]  ;;  %v309_v54 = vld [vmem:[%s3240_s13 + $0x18] sm:$0xff] }
  0x1c   :  { %130 = vmatprep.subr.mxu0 %v2423_v0  ;;  %2122 = vmatprep.subr.mxu1 %v2423_v0  ;;  %v199_v30 = vld [vmem:[%s3238_s28] sm:$0xff]  ;;  %v308_v55 = vld [vmem:[%s3240_s13 + $0x10] sm:$0xff]  ;;  %v307_v56 = vld [vmem:[%s3240_s13 + $0x8] sm:$0xff] }
  0x1d   :  { %131 = vmatpush1.msra.mxu0 %v95_v6  ;;  %2123 = vmatpush3.msra.mxu1 %v201_v28  ;;  %v1958_v31 = vld [vmem:[%s3239_s9] ss:$0 sm:$0xff]  ;;  %s3242_s9 = sld [smem:[#allocation8_spill]]  ;;  %v304_v1 = vld [vmem:[%s3241_s1 + $0x8] sm:$0xff]  ;;  %v305_v3 = vld [vmem:[%s3241_s1 + $0x10] sm:$0x3] }
  0x1e   :  { %132 = vmatprep.subr.mxu0 %v2423_v0  ;;  %2124 = vmatprep.subr.mxu1 %v2423_v0  ;;  %v306_v57 = vld [vmem:[%s3240_s13] sm:$0xff]  ;;  %v765_v27 = vld [vmem:[%s3246_s29 + $0x10] sm:$0xff]  ;;  %v671_v28 = vld [vmem:[%s3245_s12 + $0x8] sm:$0xff] }
  0x1f   :  { %133 = vmatpush1.msra.mxu0 %v94_v8  ;;  %2125 = vmatpush3.msra.mxu1 %v200_v29  ;;  %v303_v62 = vld [vmem:[%s3241_s1] sm:$0xff]  ;;  %v764_v29 = vld [vmem:[%s3246_s29 + $0x8] sm:$0xff] }
  0x20   :  { %134 = vmatprep.subr.mxu0 %v2423_v0  ;;  %2126 = vmatprep.subr.mxu1 %v2423_v0 }
  0x21   :  { %135 = vmatpush1.msra.mxu0 %v93_v9  ;;  %2127 = vmatpush3.msra.mxu1 %v199_v30  ;;  %v670_v30 = vld [vmem:[%s3245_s12] sm:$0xff] }
  0x22   :  { %136 = vmatprep.subr.mxu0 %v2423_v0  ;;  %2131 = vmatprep.subr.mxu1 %v2423_v0 }
  0x23   :  { %137 = vmatpush1.msra.mxu0 %v92_v10  ;;  %v400_v63 = vld [vmem:[%s3242_s9 + $0x8] sm:$0xff]  ;;  %v399_v2 = vld [vmem:[%s3242_s9] sm:$0xff] }
  0x24   :  { %138 = vmatprep.subr.mxu0 %v2423_v0 }
  0x25   :  { %139 = vmatpush1.msra.mxu0 %v91_v11 }
  0x26   :  { %140 = vmatprep.subr.mxu0 %v2423_v0 }
  0x27   :  { %141 = vmatpush1.msra.mxu0 %v90_v12 }
  0x28   :  { %142 = vmatprep.subr.mxu0 %v2423_v0 }
  0x29   :  { %143 = vmatpush1.msra.mxu0 %v89_v13 }
  0x2a   :  { %144 = vmatprep.subr.mxu0 %v2423_v0 }
  0x2b   :  { %145 = vmatpush1.msra.mxu0 %v88_v14 }
  0x2c   :  { %146 = vmatprep.subr.mxu0 %v2423_v0 }
  0x2d   :  { %147 = vmatpush1.msra.mxu0 %v87_v15 }
  0x2e   :  { %148 = vmatprep.subr.mxu0 %v2423_v0 }
  0x2f   :  { %149 = vmatpush1.msra.mxu0 %v86_v16  ;;  %v477_v16 = vld [vmem:[%s3243_s10] sm:$0xff] }
  0x30   :  { %150 = vmatprep.subr.mxu0 %v2423_v0 }
  0x31   :  { %151 = vmatpush1.msra.mxu0 %v85_v17 }
  0x32   :  { %168 = vmatprep.subr.mxu0 %v2423_v0 }
  0x33   :  { %169 = vmatpush2.msra.mxu0 %v108_v18 }
  0x34   :  { %170 = vmatprep.subr.mxu0 %v2423_v0 }
  0x35   :  { %171 = vmatpush2.msra.mxu0 %v107_v19  ;;  %v478_v19 = vld [vmem:[%s3243_s10 + $0x8] sm:$0xff] }
  0x36   :  { %172 = vmatprep.subr.mxu0 %v2423_v0 }
  0x37   :  { %173 = vmatpush2.msra.mxu0 %v106_v20  ;;  %v479_v20 = vld [vmem:[%s3243_s10 + $0x10] sm:$0xff] }
  0x38   :  { %174 = vmatprep.subr.mxu0 %v2423_v0 }
  0x39   :  { %175 = vmatpush2.msra.mxu0 %v105_v21  ;;  %v474_v21 = vld [vmem:[%s3244_s11] sm:$0xff] }
  0x3a   :  { %176 = vmatprep.subr.mxu0 %v2423_v0 }
  0x3b   :  { %177 = vmatpush2.msra.mxu0 %v104_v22  ;;  %v475_v22 = vld [vmem:[%s3244_s11 + $0x8] sm:$0xff] }
  0x3c   :  { %178 = vmatprep.subr.mxu0 %v2423_v0 }
  0x3d   :  { %179 = vmatpush2.msra.mxu0 %v103_v23  ;;  %v476_v23 = vld [vmem:[%s3244_s11 + $0x10] sm:$0xff] }
  0x3e   :  { %180 = vmatprep.subr.mxu0 %v2423_v0 }
  0x3f   :  { %181 = vmatpush2.msra.mxu0 %v102_v24  ;;  %v673_v24 = vld [vmem:[%s3245_s12 + $0x18] sm:$0xff] }
  0x40   :  { %182 = vmatprep.subr.mxu0 %v2423_v0 }
  0x41   :  { %183 = vmatpush2.msra.mxu0 %v101_v25  ;;  %v766_v25 = vld [vmem:[%s3246_s29 + $0x18] sm:$0xff] }
  0x42   :  { %185 = vmatmul.mubr.f32.vlgmr.msra.gmra.mxu0 %v83_v26  ;;  %2148 = vmatprep.subr.mxu0 %v2423_v0  ;;  %v672_v26 = vld [vmem:[%s3245_s12 + $0x10] sm:$0xff] }
  0x43   :  { %2152 = vmatprep.mubr.msk.f32.mxu0 %vm2424_vm1, %v2423_v0  ;;  %2149 = vmatpush3.msra.mxu0 %v400_v63 }
  0x44   :  { %2150 = vmatprep.subr.mxu0 %v2423_v0 }
  0x45   :  { %2151 = vmatpush3.msra.mxu0 %v399_v2 }
  0x46   :  { %2181 = vmatprep.subr.mxu0 %v2423_v0 }
 0x102   :  { %v186_v32 = vpop.f32.mrf.mxu0 }
 0x103   :  { %v187_v33 = vadd.f32 %v1958_v31, %v186_v32  ;;  %v763_v31 = vld [vmem:[%s3246_s29] sm:$0xff] }
 0x104   :  { %v188_v34 = vpop.f32.mrf.mxu0 }
 0x105   :  { %v190_v35 = vmul.f32 %v187_v33, %v187_v33 }
 0x107   :  { %v191_v36 = vmul.f32 %v190_v35, %v187_v33 }
 0x109   :  { %v192_v37 = vmul.f32 0.044715, %v191_v36 }
 0x10b   :  { %v193_v38 = vadd.f32 %v192_v37, %v187_v33 }
 0x10d   :  { %v194_v39 = vmul.f32 0.7978846, %v193_v38 }
 0x10f   :  { %2385 = vtanh.f32 %v194_v39  ;;  %v664_v39 = vld [vmem:[%s3199_s8] sm:$0xff] }
 0x11c   :  { %v2386_v40 = vpop.eup %2385 }
 0x11d   :  { %v196_v41 = vadd.f32 1.0, %v2386_v40 }
 0x11f   :  { %v197_v42 = vmul.f32 0.5, %v196_v41 }
 0x121   :  { %v198_v43 = vmul.f32 %v197_v42, %v187_v33 }
 0x123   :  { %2129 = vmatmul.mubr.msk.f32.vlgmr.msra.gmra.mxu1 %vm203_vm2, %v198_v43 }
 0x124   :  { %2139 = vmatprep.mubr.msk.f32.mxu1 %vm2424_vm1, %v2423_v0  ;;  %2132 = vmatpush3.msra.mxu1 %v309_v54 }
 0x125   :  { %2133 = vmatprep.subr.mxu1 %v2423_v0 }
 0x126   :  { %2134 = vmatpush3.msra.mxu1 %v308_v55 }
 0x127   :  { %2135 = vmatprep.subr.mxu1 %v2423_v0 }
 0x128   :  { %2136 = vmatpush3.msra.mxu1 %v307_v56 }
 0x129   :  { %2137 = vmatprep.subr.mxu1 %v2423_v0 }
 0x12a   :  { %2138 = vmatpush3.msra.mxu1 %v306_v57  ;;  %v848_v57 = vld [vmem:[%s3200_s16 + $0x8] sm:$0xff] }
 0x12b   :  { %2155 = vmatprep.subr.mxu1 %v2423_v0  ;;  %2140 = vmatmul.mubr.msk.f32.vlgmr.msra.gmra.mxu1 %vm203_vm2, %v303_v62 }
 0x12c   :  { %2142 = vmatprep.mubr.msk.f32.mxu1 %vm2424_vm1, %v2423_v0 }
 0x12f   :  { %2143 = vmatmul.mubr.msk.f32.gmra.mxu1 %vm203_vm2, %v304_v1 }
 0x130   :  { %2145 = vmatprep.mubr.msk.f32.mxu1 %vm2424_vm1, %v2423_v0 }
 0x133   :  { %2146 = vmatmul.mubr.msk.f32.gmra.mxu1 %vm203_vm2, %v305_v3 }
 0x134   :  { %2157 = vmatprep.mubr.msk.f32.mxu1 %vm2424_vm1, %v2423_v0 }
 0x1e3   :  { %v273_v44 = vpop.f32.mrf.mxu1 }
 0x1e4   :  { %v280_v45 = vsel %vm279_vm3, %v273_v44, -inf }
 0x1e5   :  { %281 = vmax.xlane.f32.xlu0 %v280_v45  ;;  %v2130_v46 = vpop.f32.mrf.mxu1  ;;  %v850_v45 = vld [vmem:[%s3200_s16 + $0x18] sm:$0xff] }
 0x1eb   :  { %v385_v10 = vpop.f32.mrf.mxu1 }
 0x1ed   :  { %v2141_v11 = vpop.f32.mrf.mxu1 }
 0x1ef   :  { %v390_v12 = vpop.f32.mrf.mxu1 }
 0x1f1   :  { %v2144_v13 = vpop.f32.mrf.mxu1 }
 0x1f3   :  { %v395_v14 = vpop.f32.mrf.mxu1 }
 0x1f5   :  { %v2147_v15 = vpop.f32.mrf.mxu1 }
 0x1f6   :  { %v1032_v15 = vld [vmem:[%s3201_s7] sm:$0xff] }
 0x1f7   :  { %vm1035_vm10 = vcmp.ne.f32.partialorder %v1032_v15, 0.0 }
 0x26e   :  { %v282_v49 = vpop.xlane.xlu0 %281 }
 0x26f   :  { %vm283_vm4 = vcmp.eq.f32.partialorder %v273_v44, %v282_v49  ;;  %v665_v44 = vld [vmem:[%s3199_s8 + $0x8] sm:$0xff] }
 0x270   :  { %v284_v50 = vsel %vm283_vm4, %v2693_v48, 16 }
 0x271   :  { %v285_v51 = vsel %vm279_vm3, %v284_v50, 2147483647 }
 0x272   :  { %v287_v52 = vshra.s32 %v285_v51, 16  ;;  %v286_v58 = vand.u32 65535, %v285_v51 }
 0x274   :  { %v289_v53 = vcvt.s32.f32 %v287_v52  ;;  %v288_v60 = vcvt.s32.f32 %v286_v58  ;;  %v666_v52 = vld [vmem:[%s3199_s8 + $0x10] sm:$0xff]  ;;  %v847_v58 = vld [vmem:[%s3200_s16] sm:$0xff] }
 0x276   :  { %290 = vmin.xlane.f32.xlu0 %v289_v53 }
 0x2ff   :  { %v291_v59 = vpop.xlane.xlu0 %290 }
 0x300   :  { %vm292_vm5 = vcmp.eq.f32.partialorder %v289_v53, %v291_v59  ;;  %v297_v4 = vcvt.f32.s32 %v291_v59  ;;  %v849_v53 = vld [vmem:[%s3200_s16 + $0x10] sm:$0xff] }
 0x301   :  { %v293_v61 = vsel %vm292_vm5, %v288_v60, inf }
 0x302   :  { %294 = vmin.xlane.f32.xlu1 %v293_v61  ;;  %v298_v6 = vshll.u32 %v297_v4, 16 }
 0x38b   :  { %v295_v5 = vpop.xlane.xlu1 %294 }
 0x38c   :  { %v296_v7 = vcvt.f32.s32 %v295_v5 }
 0x38e   :  { %v2739_v8 = vadd.s32 %v298_v6, %v296_v7 }
 0x390   :  { %vm300_vm6 = vcmp.eq.s32.totalorder %v2693_v48, %v2739_v8 }
 0x391   :  { %v1961_v9 = vsel %vm300_vm6, 1.0, %v2423_v0 }
 0x392   :  { %2153 = vmatmul.mubr.msk.f32.vlgmr.msra.gmra.mxu0 %vm279_vm3, %v1961_v9 }
 0x393   :  { %2189 = vmatprep.mubr.msk.f32.mxu0 %vm2424_vm1, %v2423_v0  ;;  %2182 = vmatpush3.msra.mxu0 %v673_v24  ;;  %v1034_v24 = vld [vmem:[%s3201_s7 + $0x10] sm:$0xff] }
 0x394   :  { %2183 = vmatprep.subr.mxu0 %v2423_v0  ;;  %vm1037_vm13 = vcmp.ne.f32.partialorder %v1034_v24, 0.0  ;;  %v1398_v24 = vld [vmem:[%s3204_s20 + $0x58] sm:$0xff] }
 0x395   :  { %2184 = vmatpush3.msra.mxu0 %v672_v26 }
 0x396   :  { %2185 = vmatprep.subr.mxu0 %v2423_v0 }
 0x397   :  { %2186 = vmatpush3.msra.mxu0 %v671_v28 }
 0x398   :  { %2187 = vmatprep.subr.mxu0 %v2423_v0 }
 0x399   :  { %2188 = vmatpush3.msra.mxu0 %v670_v30 }
 0x39a   :  { %2215 = vmatprep.subr.mxu0 %v2423_v0 }
 0x452   :  { %v470_v17 = vpop.f32.mrf.mxu0 }
 0x453   :  { %2156 = vmatpush3.msra.mxu1 %v470_v17 }
 0x454   :  { %v2154_v18 = vpop.f32.mrf.mxu0  ;;  %2158 = vmatmul.mubr.msk.f32.vlgmr.msra.gmra.mxu1 %vm480_vm7, %v477_v16  ;;  %2166 = vmatprep.subr.mxu1 %v2423_v0 }
 0x455   :  { %2167 = vmatpush3.msk.msra.mxu1 %vm580_vm8, %v395_v14  ;;  %2160 = vmatprep.mubr.msk.f32.mxu1 %vm2424_vm1, %v2423_v0  ;;  %v1033_v18 = vld [vmem:[%s3201_s7 + $0x8] sm:$0xff] }
 0x456   :  { %2168 = vmatprep.subr.mxu1 %v2423_v0  ;;  %vm1036_vm12 = vcmp.ne.f32.partialorder %v1033_v18, 0.0 }
 0x457   :  { %2169 = vmatpush3.msra.mxu1 %v390_v12 }
 0x458   :  { %2161 = vmatmul.mubr.msk.f32.gmra.mxu1 %vm480_vm7, %v478_v19  ;;  %2170 = vmatprep.subr.mxu1 %v2423_v0 }
 0x459   :  { %2171 = vmatpush3.msra.mxu1 %v385_v10  ;;  %2163 = vmatprep.mubr.msk.f32.mxu1 %vm2424_vm1, %v2423_v0 }
 0x45a   :  { %2198 = vmatprep.subr.mxu1 %v2423_v0 }
 0x45c   :  { %2164 = vmatmul.mubr.msk.f32.gmra.mxu1 %vm480_vm7, %v479_v20 }
 0x45d   :  { %2172 = vmatprep.mubr.msk.f32.mxu1 %vm2424_vm1, %v2423_v0 }
 0x460   :  { %2173 = vmatmul.mubr.msk.f32.vlgmr.msra.gmra.mxu1 %vm570_vm9, %v474_v21 }
 0x461   :  { %2175 = vmatprep.mubr.msk.f32.mxu1 %vm2424_vm1, %v2423_v0  ;;  %2199 = vmatpush3.msra.mxu1 %v766_v25 }
 0x462   :  { %2200 = vmatprep.subr.mxu1 %v2423_v0 }
 0x463   :  { %2201 = vmatpush3.msra.mxu1 %v765_v27 }
 0x464   :  { %2176 = vmatmul.mubr.msk.f32.gmra.mxu1 %vm570_vm9, %v475_v22  ;;  %2202 = vmatprep.subr.mxu1 %v2423_v0 }
 0x465   :  { %2178 = vmatprep.mubr.msk.f32.mxu1 %vm2424_vm1, %v2423_v0  ;;  %2203 = vmatpush3.msra.mxu1 %v764_v29 }
 0x466   :  { %2204 = vmatprep.subr.mxu1 %v2423_v0 }
 0x467   :  { %2205 = vmatpush3.msra.mxu1 %v763_v31 }
 0x468   :  { %2179 = vmatmul.mubr.msk.f32.gmra.mxu1 %vm570_vm9, %v476_v23  ;;  %2232 = vmatprep.subr.mxu1 %v2423_v0 }
 0x469   :  { %2206 = vmatprep.mubr.msk.f32.mxu1 %vm2424_vm1, %v2423_v0 }
 0x514   :  { %v556_v32 = vpop.f32.mrf.mxu1 }
 0x516   :  { %v2159_v33 = vpop.f32.mrf.mxu1 }
 0x518   :  { %v561_v34 = vpop.f32.mrf.mxu1 }
 0x51a   :  { %v2162_v35 = vpop.f32.mrf.mxu1 }
 0x51c   :  { %v566_v36 = vpop.f32.mrf.mxu1 }
 0x51e   :  { %v2165_v37 = vpop.f32.mrf.mxu1 }
 0x520   :  { %v650_v38 = vpop.f32.mrf.mxu1 }
 0x521   :  { %v651_v40 = vadd.f32 %v650_v38, %v556_v32 }
 0x522   :  { %v2174_v41 = vpop.f32.mrf.mxu1 }
 0x523   :  { %v2819_v42 = vadd.f32 %v664_v39, %v651_v40 }
 0x524   :  { %v655_v43 = vpop.f32.mrf.mxu1 }
 0x525   :  { %v656_v46 = vadd.f32 %v655_v43, %v561_v34  ;;  %2190 = vmatmul.mubr.msk.f32.vlgmr.msra.gmra.mxu0 %vm203_vm2, %v2819_v42  ;;  %2207 = vmatmul.mubr.msk.f32.vlgmr.msra.gmra.mxu1 %vm203_vm2, %v2819_v42 }
 0x526   :  { %v2177_v49 = vpop.f32.mrf.mxu1  ;;  %2192 = vmatprep.mubr.msk.f32.mxu0 %vm2424_vm1, %v2423_v0  ;;  %2209 = vmatprep.mubr.msk.f32.mxu1 %vm2424_vm1, %v2423_v0 }
 0x527   :  { %v2835_v50 = vadd.f32 %v665_v44, %v656_v46  ;;  %2216 = vmatpush3.msra.mxu0 %v850_v45 }
 0x528   :  { %v660_v51 = vpop.f32.mrf.mxu1  ;;  %2217 = vmatprep.subr.mxu0 %v2423_v0 }
 0x529   :  { %v661_v54 = vadd.f32 %v660_v51, %v566_v36  ;;  %2193 = vmatmul.mubr.msk.f32.gmra.mxu0 %vm203_vm2, %v2835_v50  ;;  %2210 = vmatmul.mubr.msk.f32.gmra.mxu1 %vm203_vm2, %v2835_v50 }
 0x52a   :  { %2195 = vmatprep.mubr.msk.f32.mxu0 %vm2424_vm1, %v2423_v0  ;;  %2212 = vmatprep.mubr.msk.f32.mxu1 %vm2424_vm1, %v2423_v0  ;;  %v2180_v55 = vpop.f32.mrf.mxu1 }
 0x52b   :  { %v2852_v56 = vadd.f32 %v666_v52, %v661_v54  ;;  %2218 = vmatpush3.msra.mxu0 %v849_v53  ;;  %v1167_v52 = vld [vmem:[%s3202_s17 + $0x18] sm:$0xff]  ;;  %v1166_v53 = vld [vmem:[%s3202_s17 + $0x10] sm:$0xff]  ;;  %v1165_v54 = vld [vmem:[%s3202_s17 + $0x8] sm:$0xff] }
 0x52c   :  { %2219 = vmatprep.subr.mxu0 %v2423_v0 }
 0x52d   :  { %2196 = vmatmul.mubr.msk.f32.gmra.mxu0 %vm203_vm2, %v2852_v56  ;;  %2213 = vmatmul.mubr.msk.f32.gmra.mxu1 %vm203_vm2, %v2852_v56 }
 0x52e   :  { %2220 = vmatpush3.msra.mxu0 %v848_v57  ;;  %2223 = vmatprep.mubr.msk.f32.mxu0 %vm2424_vm1, %v2423_v0 }
 0x52f   :  { %2221 = vmatprep.subr.mxu0 %v2423_v0  ;;  %2238 = vmatprep.mubr.msk.f32.mxu1 %vm2424_vm1, %v2423_v0 }
 0x530   :  { %2222 = vmatpush3.msra.mxu0 %v847_v58 }
 0x531   :  { %2224 = vmatmul.mubr.msk.f32.vlgmr.msra.gmra.mxu0 %vm203_vm2, %v2819_v42  ;;  %2247 = vmatprep.subr.mxu0 %v2423_v0 }
 0x532   :  { %2226 = vmatprep.mubr.msk.f32.mxu0 %vm2424_vm1, %v2423_v0 }
 0x535   :  { %2227 = vmatmul.mubr.msk.f32.gmra.mxu0 %vm203_vm2, %v2835_v50 }
 0x536   :  { %2229 = vmatprep.mubr.msk.f32.mxu0 %vm2424_vm1, %v2423_v0 }
 0x539   :  { %2230 = vmatmul.mubr.msk.f32.gmra.mxu0 %vm203_vm2, %v2852_v56 }
 0x53a   :  { %2253 = vmatprep.mubr.msk.f32.mxu0 %vm2424_vm1, %v2423_v0 }
 0x5e5   :  { %v749_v59 = vpop.f32.mrf.mxu0  ;;  %v833_v60 = vpop.f32.mrf.mxu1 }
 0x5e7   :  { %v2191_v61 = vpop.f32.mrf.mxu0  ;;  %v2208_v62 = vpop.f32.mrf.mxu1 }
 0x5e9   :  { %v754_v63 = vpop.f32.mrf.mxu0  ;;  %v838_v1 = vpop.f32.mrf.mxu1 }
 0x5eb   :  { %v2194_v2 = vpop.f32.mrf.mxu0  ;;  %v2211_v3 = vpop.f32.mrf.mxu1 }
 0x5ec   :  { %v1164_v2 = vld [vmem:[%s3202_s17] sm:$0xff]  ;;  %v1263_v3 = vld [vmem:[%s3203_s18 + $0x18] sm:$0xff] }
 0x5ed   :  { %v759_v4 = vpop.f32.mrf.mxu0  ;;  %v843_v5 = vpop.f32.mrf.mxu1 }
 0x5ee   :  { %2233 = vmatpush3.xpose.msk.msra.mxu1 %vm203_vm2, %v843_v5 }
 0x5ef   :  { %v2197_v6 = vpop.f32.mrf.mxu0  ;;  %v2214_v7 = vpop.f32.mrf.mxu1  ;;  %2234 = vmatprep.subr.mxu1 %v2423_v0 }
 0x5f1   :  { %v917_v9 = vpop.f32.mrf.mxu0 }
 0x5f2   :  { %2235 = vmatpush3.xpose.msk.msra.mxu1 %vm203_vm2, %v838_v1 }
 0x5f3   :  { %v2225_v10 = vpop.f32.mrf.mxu0  ;;  %2236 = vmatprep.subr.mxu1 %v2423_v0 }
 0x5f5   :  { %v922_v11 = vpop.f32.mrf.mxu0 }
 0x5f6   :  { %2237 = vmatpush3.xpose.msk.msra.mxu1 %vm203_vm2, %v833_v60 }
 0x5f7   :  { %v2228_v12 = vpop.f32.mrf.mxu0  ;;  %2262 = vmatprep.subr.mxu1 %v2423_v0 }
 0x5f8   :  { %v1261_v12 = vld [vmem:[%s3203_s18 + $0x8] sm:$0xff] }
 0x5f9   :  { %v927_v13 = vpop.f32.mrf.mxu0  ;;  %2239 = vmatmul.mubr.msk.f32.vlgmr.msra.gmra.mxu1 %vm203_vm2, %v749_v59 }
 0x5fa   :  { %2248 = vmatpush3.msra.mxu0 %v927_v13  ;;  %2241 = vmatprep.mubr.msk.f32.mxu1 %vm2424_vm1, %v2423_v0  ;;  %v1260_v13 = vld [vmem:[%s3203_s18] sm:$0xff] }
 0x5fb   :  { %v2231_v14 = vpop.f32.mrf.mxu0  ;;  %2249 = vmatprep.subr.mxu0 %v2423_v0  ;;  %2263 = vmatpush3.msra.mxu1 %v1167_v52 }
 0x5fc   :  { %2250 = vmatpush3.msra.mxu0 %v922_v11  ;;  %2264 = vmatprep.subr.mxu1 %v2423_v0 }
 0x5fd   :  { %2242 = vmatmul.mubr.msk.f32.gmra.mxu1 %vm203_vm2, %v754_v63  ;;  %2251 = vmatprep.subr.mxu0 %v2423_v0 }
 0x5fe   :  { %2252 = vmatpush3.msra.mxu0 %v917_v9  ;;  %2244 = vmatprep.mubr.msk.f32.mxu1 %vm2424_vm1, %v2423_v0 }
 0x5ff   :  { %2279 = vmatprep.subr.mxu0 %v2423_v0  ;;  %2265 = vmatpush3.msra.mxu1 %v1166_v53 }
 0x600   :  { %2266 = vmatprep.subr.mxu1 %v2423_v0 }
 0x601   :  { %2245 = vmatmul.mubr.msk.f32.gmra.mxu1 %vm203_vm2, %v759_v4  ;;  %v1262_v4 = vld [vmem:[%s3203_s18 + $0x10] sm:$0xff] }
 0x602   :  { %2270 = vmatprep.mubr.msk.f32.mxu1 %vm2424_vm1, %v2423_v0  ;;  %2267 = vmatpush3.msra.mxu1 %v1165_v54 }
 0x603   :  { %2268 = vmatprep.subr.mxu1 %v2423_v0 }
 0x604   :  { %2269 = vmatpush3.msra.mxu1 %v1164_v2 }
 0x605   :  { %2296 = vmatprep.subr.mxu1 %v2423_v0 }
 0x6b9   :  { %v1015_v16 = vpop.f32.mrf.mxu1 }
 0x6ba   :  { %v1029_v17 = vmul.f32 0.17677669, %v1015_v16 }
 0x6bb   :  { %v2240_v19 = vpop.f32.mrf.mxu1 }
 0x6bc   :  { %v1038_v20 = vsel %vm1035_vm10, %v1029_v17, -1e+09 }
 0x6bd   :  { %v1020_v21 = vpop.f32.mrf.mxu1  ;;  %v1042_v22 = vsel %vm1041_vm11, %v1038_v20, -inf }
 0x6be   :  { %v1030_v23 = vmul.f32 0.17677669, %v1020_v21  ;;  %1043 = vmax.xlane.f32.xlu1 %v1042_v22  ;;  %v1401_v22 = vld [vmem:[%s3204_s20 + $0x70] sm:$0xff] }
 0x6bf   :  { %v2243_v25 = vpop.f32.mrf.mxu1 }
 0x6c0   :  { %v1039_v26 = vsel %vm1036_vm12, %v1030_v23, -1e+09  ;;  %v1399_v23 = vld [vmem:[%s3204_s20 + $0x60] sm:$0xff]  ;;  %v1397_v25 = vld [vmem:[%s3204_s20 + $0x50] sm:$0xff] }
 0x6c1   :  { %v1025_v27 = vpop.f32.mrf.mxu1  ;;  %v1045_v28 = vsel %vm1041_vm11, %v1039_v26, -inf }
 0x6c2   :  { %v1031_v29 = vmul.f32 0.17677669, %v1025_v27  ;;  %1046 = vmax.xlane.f32.xlu0 %v1045_v28  ;;  %v1395_v27 = vld [vmem:[%s3204_s20 + $0x40] sm:$0xff]  ;;  %v1394_v28 = vld [vmem:[%s3204_s20 + $0x38] sm:$0xff] }
 0x6c3   :  { %v2246_v30 = vpop.f32.mrf.mxu1 }
 0x6c4   :  { %v1040_v31 = vsel %vm1037_vm13, %v1031_v29, -1e+09  ;;  %v1393_v29 = vld [vmem:[%s3204_s20 + $0x30] sm:$0xff]  ;;  %v1392_v30 = vld [vmem:[%s3204_s20 + $0x28] sm:$0xff] }
 0x6c5   :  { %v1048_v32 = vsel %vm1041_vm11, %v1040_v31, -inf }
 0x6c6   :  { %1049 = vmax.xlane.f32.xlu1 %v1048_v32  ;;  %v1390_v32 = vld [vmem:[%s3204_s20 + $0x18] sm:$0xff] }
 0x747   :  { %v1044_v33 = vpop.xlane.xlu1 %1043 }
 0x748   :  { %v1051_v34 = vsub.f32 %v1038_v20, %v1044_v33  ;;  %v1389_v33 = vld [vmem:[%s3204_s20 + $0x10] sm:$0xff] }
 0x74a   :  { %v1054_v35 = vmul.f32 1.442695, %v1051_v34  ;;  %v1388_v34 = vld [vmem:[%s3204_s20 + $0x8] sm:$0xff] }
 0x74b   :  { %v1047_v36 = vpop.xlane.xlu0 %1046 }
 0x74c   :  { %2387 = vpow2.f32 %v1054_v35  ;;  %v1052_v37 = vsub.f32 %v1039_v26, %v1047_v36  ;;  %v1396_v26 = vld [vmem:[%s3204_s20 + $0x48] sm:$0xff]  ;;  %v1387_v35 = vld [vmem:[%s3204_s20] sm:$0xff] }
 0x74d   :  { %v1994_v36 = vld [vmem:[%s3205_s19] ss:$0 sm:$0xff] }
 0x74e   :  { %v1056_v38 = vmul.f32 1.442695, %v1052_v37 }
 0x74f   :  { %v1050_v39 = vpop.xlane.xlu1 %1049 }
 0x750   :  { %2389 = vpow2.f32 %v1056_v38  ;;  %v1053_v40 = vsub.f32 %v1040_v31, %v1050_v39  ;;  %v1391_v31 = vld [vmem:[%s3204_s20 + $0x20] sm:$0xff] }
 0x752   :  { %v1058_v41 = vmul.f32 1.442695, %v1053_v40 }
 0x754   :  { %2391 = vpow2.f32 %v1058_v41 }
 0x759   :  { %v2388_v43 = vpop.eup %2387 }
 0x75a   :  { %v1060_v44 = vsel %vm1041_vm11, %v2388_v43, 0.0 }
 0x75b   :  { %1061 = vadd.xlane.f32.xlu0 %v1060_v44 }
 0x75d   :  { %v2390_v45 = vpop.eup %2389 }
 0x75e   :  { %v1063_v46 = vsel %vm1041_vm11, %v2390_v45, 0.0 }
 0x75f   :  { %1064 = vadd.xlane.f32.xlu1 %v1063_v46 }
 0x761   :  { %v2392_v49 = vpop.eup %2391 }
 0x762   :  { %v1066_v51 = vsel %vm1041_vm11, %v2392_v49, 0.0 }
 0x763   :  { %1067 = vadd.xlane.f32.xlu0 %v1066_v51 }
 0x7e4   :  { %v1062_v55 = vpop.xlane.xlu0 %1061 }
 0x7e5   :  { %2393 = vrcp.f32 %v1062_v55 }
 0x7e8   :  { %v1065_v57 = vpop.xlane.xlu1 %1064 }
 0x7e9   :  { %2395 = vrcp.f32 %v1065_v57 }
 0x7ec   :  { %v1068_v58 = vpop.xlane.xlu0 %1067 }
 0x7ed   :  { %2397 = vrcp.f32 %v1068_v58 }
 0x7f2   :  { %v2394_v59 = vpop.eup %2393 }
 0x7f3   :  { %v1072_v60 = vmul.f32 %v2394_v59, %v2388_v43 }
 0x7f5   :  { %2254 = vmatmul.mubr.msk.f32.vlgmr.msra.gmra.mxu0 %vm1041_vm11, %v1072_v60 }
 0x7f6   :  { %v2396_v61 = vpop.eup %2395  ;;  %2256 = vmatprep.mubr.msk.f32.mxu0 %vm2424_vm1, %v2423_v0  ;;  %2280 = vmatpush3.msra.mxu0 %v1263_v3 }
 0x7f7   :  { %v1073_v62 = vmul.f32 %v2396_v61, %v2390_v45  ;;  %2281 = vmatprep.subr.mxu0 %v2423_v0 }
 0x7f8   :  { %2282 = vmatpush3.msra.mxu0 %v1262_v4 }
 0x7f9   :  { %2257 = vmatmul.mubr.msk.f32.gmra.mxu0 %vm1041_vm11, %v1073_v62  ;;  %2283 = vmatprep.subr.mxu0 %v2423_v0 }
 0x7fa   :  { %v2398_v63 = vpop.eup %2397  ;;  %2259 = vmatprep.mubr.msk.f32.mxu0 %vm2424_vm1, %v2423_v0  ;;  %2284 = vmatpush3.msra.mxu0 %v1261_v12 }
 0x7fb   :  { %v1074_v1 = vmul.f32 %v2398_v63, %v2392_v49  ;;  %2285 = vmatprep.subr.mxu0 %v2423_v0 }
 0x7fc   :  { %2286 = vmatpush3.msra.mxu0 %v1260_v13 }
 0x7fd   :  { %2260 = vmatmul.mubr.msk.f32.gmra.mxu0 %vm1041_vm11, %v1074_v1  ;;  %2337 = vmatprep.subr.mxu0 %v2423_v0 }
 0x7fe   :  { %2287 = vmatprep.mubr.msk.f32.mxu0 %vm2424_vm1, %v2423_v0 }
 0x8b5   :  { %v1150_v5 = vpop.f32.mrf.mxu0 }
 0x8b6   :  { %2271 = vmatmul.mubr.msk.f32.vlgmr.msra.gmra.mxu1 %vm203_vm2, %v1150_v5 }
 0x8b7   :  { %v2255_v6 = vpop.f32.mrf.mxu0  ;;  %2273 = vmatprep.mubr.msk.f32.mxu1 %vm2424_vm1, %v2423_v0 }
 0x8b9   :  { %v1155_v7 = vpop.f32.mrf.mxu0 }
 0x8ba   :  { %2274 = vmatmul.mubr.msk.f32.gmra.mxu1 %vm203_vm2, %v1155_v7 }
 0x8bb   :  { %v2258_v9 = vpop.f32.mrf.mxu0  ;;  %2276 = vmatprep.mubr.msk.f32.mxu1 %vm2424_vm1, %v2423_v0 }
 0x8bd   :  { %v1160_v10 = vpop.f32.mrf.mxu0 }
 0x8be   :  { %2277 = vmatmul.mubr.msk.f32.gmra.mxu1 %vm203_vm2, %v1160_v10 }
 0x8bf   :  { %v2261_v11 = vpop.f32.mrf.mxu0  ;;  %2328 = vmatprep.mubr.msk.f32.mxu1 %vm2424_vm1, %v2423_v0 }
 0x976   :  { %v1243_v14 = vpop.f32.mrf.mxu1 }
 0x977   :  { %v2967_v15 = vadd.f32 %v1243_v14, %v2819_v42 }
 0x978   :  { %v2272_v16 = vpop.f32.mrf.mxu1 }
 0x979   :  { %2288 = vmatmul.mubr.msk.f32.vlgmr.msra.gmra.mxu0 %vm203_vm2, %v2967_v15 }
 0x97a   :  { %v1248_v17 = vpop.f32.mrf.mxu1  ;;  %2290 = vmatprep.mubr.msk.f32.mxu0 %vm2424_vm1, %v2423_v0 }
 0x97b   :  { %v2974_v18 = vadd.f32 %v1248_v17, %v2835_v50  ;;  %v1402_v50 = vld [vmem:[%s3204_s20 + $0x78] sm:$0xff] }
 0x97c   :  { %v2275_v19 = vpop.f32.mrf.mxu1  ;;  %2297 = vmatpush3.msra.mxu1 %v1402_v50 }
 0x97d   :  { %2291 = vmatmul.mubr.msk.f32.gmra.mxu0 %vm203_vm2, %v2974_v18  ;;  %2298 = vmatprep.subr.mxu1 %v2423_v0  ;;  %v1998_v19 = vld [vmem:[%s3206_s21] ss:$0 sm:$0xff] }
 0x97e   :  { %v1253_v20 = vpop.f32.mrf.mxu1  ;;  %2293 = vmatprep.mubr.msk.f32.mxu0 %vm2424_vm1, %v2423_v0  ;;  %2299 = vmatpush3.msra.mxu1 %v1401_v22 }
 0x97f   :  { %v2981_v42 = vadd.f32 %v1253_v20, %v2852_v56  ;;  %2300 = vmatprep.subr.mxu1 %v2423_v0  ;;  %v1400_v56 = vld [vmem:[%s3204_s20 + $0x68] sm:$0xff] }
 0x980   :  { %v2278_v21 = vpop.f32.mrf.mxu1  ;;  %2301 = vmatpush3.msra.mxu1 %v1400_v56 }
 0x981   :  { %2294 = vmatmul.mubr.msk.f32.gmra.mxu0 %vm203_vm2, %v2981_v42  ;;  %2302 = vmatprep.subr.mxu1 %v2423_v0 }
 0x982   :  { %2345 = vmatprep.mubr.msk.f32.mxu0 %vm2424_vm1, %v2423_v0  ;;  %2303 = vmatpush3.msra.mxu1 %v1399_v23 }
 0x983   :  { %2304 = vmatprep.subr.mxu1 %v2423_v0 }
 0x984   :  { %2305 = vmatpush3.msra.mxu1 %v1398_v24 }
 0x985   :  { %2306 = vmatprep.subr.mxu1 %v2423_v0 }
 0x986   :  { %2307 = vmatpush3.msra.mxu1 %v1397_v25 }
 0x987   :  { %2308 = vmatprep.subr.mxu1 %v2423_v0 }
 0x988   :  { %2309 = vmatpush3.msra.mxu1 %v1396_v26 }
 0x989   :  { %2310 = vmatprep.subr.mxu1 %v2423_v0 }
 0x98a   :  { %2311 = vmatpush3.msra.mxu1 %v1395_v27 }
 0x98b   :  { %2312 = vmatprep.subr.mxu1 %v2423_v0 }
 0x98c   :  { %2313 = vmatpush3.msra.mxu1 %v1394_v28 }
 0x98d   :  { %2314 = vmatprep.subr.mxu1 %v2423_v0 }
 0x98e   :  { %2315 = vmatpush3.msra.mxu1 %v1393_v29 }
 0x98f   :  { %2316 = vmatprep.subr.mxu1 %v2423_v0 }
 0x990   :  { %2317 = vmatpush3.msra.mxu1 %v1392_v30 }
 0x991   :  { %2318 = vmatprep.subr.mxu1 %v2423_v0 }
 0x992   :  { %2319 = vmatpush3.msra.mxu1 %v1391_v31 }
 0x993   :  { %2320 = vmatprep.subr.mxu1 %v2423_v0 }
 0x994   :  { %2321 = vmatpush3.msra.mxu1 %v1390_v32 }
 0x995   :  { %2322 = vmatprep.subr.mxu1 %v2423_v0 }
 0x996   :  { %2323 = vmatpush3.msra.mxu1 %v1389_v33 }
 0x997   :  { %2324 = vmatprep.subr.mxu1 %v2423_v0 }
 0x998   :  { %2325 = vmatpush3.msra.mxu1 %v1388_v34 }
 0x999   :  { %2326 = vmatprep.subr.mxu1 %v2423_v0 }
 0x99a   :  { %2327 = vmatpush3.msra.mxu1 %v1387_v35 }
 0x99b   :  { %2365 = vmatprep.subr.mxu1 %v2423_v0 }
 0xa39   :  { %v1346_v37 = vpop.f32.mrf.mxu0 }
 0xa3a   :  { %v1347_v38 = vadd.f32 %v1994_v36, %v1346_v37 }
 0xa3b   :  { %v2289_v39 = vpop.f32.mrf.mxu0 }
 0xa3c   :  { %v1360_v40 = vmul.f32 %v1347_v38, %v1347_v38 }
 0xa3d   :  { %v1351_v41 = vpop.f32.mrf.mxu0 }
 0xa3e   :  { %v1363_v43 = vmul.f32 %v1360_v40, %v1347_v38  ;;  %v1352_v44 = vadd.f32 %v1994_v36, %v1351_v41 }
 0xa3f   :  { %v2292_v45 = vpop.f32.mrf.mxu0 }
 0xa40   :  { %v1366_v46 = vmul.f32 0.044715, %v1363_v43  ;;  %v1361_v49 = vmul.f32 %v1352_v44, %v1352_v44  ;;  %v1559_v45 = vld [vmem:[%s3207_s24 + $0x18] sm:$0xff] }
 0xa41   :  { %v1356_v51 = vpop.f32.mrf.mxu0  ;;  %2338 = vmatpush3.msra.mxu0 %v1559_v45 }
 0xa42   :  { %v1369_v52 = vadd.f32 %v1366_v46, %v1347_v38  ;;  %v1364_v53 = vmul.f32 %v1361_v49, %v1352_v44  ;;  %v1357_v54 = vadd.f32 %v1994_v36, %v1356_v51  ;;  %2339 = vmatprep.subr.mxu0 %v2423_v0  ;;  %v1558_v46 = vld [vmem:[%s3207_s24 + $0x10] sm:$0xff]  ;;  %v1557_v49 = vld [vmem:[%s3207_s24 + $0x8] sm:$0xff]  ;;  %v1556_v51 = vld [vmem:[%s3207_s24] sm:$0xff] }
 0xa43   :  { %v2295_v55 = vpop.f32.mrf.mxu0  ;;  %2340 = vmatpush3.msra.mxu0 %v1558_v46 }
 0xa44   :  { %v1372_v57 = vmul.f32 0.7978846, %v1369_v52  ;;  %v1367_v58 = vmul.f32 0.044715, %v1364_v53  ;;  %v1362_v59 = vmul.f32 %v1357_v54, %v1357_v54  ;;  %2341 = vmatprep.subr.mxu0 %v2423_v0  ;;  %v1694_v52 = vld [vmem:[%s3208_s2 + $0x8] sm:$0xff]  ;;  %v1693_v53 = vld [vmem:[%s3208_s2] sm:$0xff] }
 0xa45   :  { %2342 = vmatpush3.msra.mxu0 %v1557_v49  ;;  %v3111_v55 = vld [vmem:[%s3209_s5 + $0x8] sm:$0xff] }
 0xa46   :  { %2399 = vtanh.f32 %v1372_v57  ;;  %v1370_v60 = vadd.f32 %v1367_v58, %v1352_v44  ;;  %v1365_v61 = vmul.f32 %v1362_v59, %v1357_v54  ;;  %2343 = vmatprep.subr.mxu0 %v2423_v0  ;;  %v3120_v57 = vld [vmem:[%s3209_s5 + $0x10] sm:$0xff] }
 0xa47   :  { %2344 = vmatpush3.msra.mxu0 %v1556_v51 }
 0xa48   :  { %v1373_v62 = vmul.f32 0.7978846, %v1370_v60  ;;  %v1368_v63 = vmul.f32 0.044715, %v1365_v61  ;;  %2354 = vmatprep.subr.mxu0 %v2423_v0 }
 0xa4a   :  { %2401 = vtanh.f32 %v1373_v62  ;;  %v1371_v1 = vadd.f32 %v1368_v63, %v1357_v54 }
 0xa4c   :  { %v1374_v2 = vmul.f32 0.7978846, %v1371_v1 }
 0xa4e   :  { %2403 = vtanh.f32 %v1374_v2 }
 0xa53   :  { %v2400_v3 = vpop.eup %2399 }
 0xa54   :  { %v1378_v4 = vadd.f32 1.0, %v2400_v3 }
 0xa56   :  { %v1381_v5 = vmul.f32 0.5, %v1378_v4 }
 0xa57   :  { %v2402_v6 = vpop.eup %2401 }
 0xa58   :  { %v1384_v7 = vmul.f32 %v1381_v5, %v1347_v38  ;;  %v1379_v9 = vadd.f32 1.0, %v2402_v6  ;;  %v1999_v5 = vld [vmem:[%s3210_s22] ss:$0 sm:$0xff] }
 0xa5a   :  { %2329 = vmatmul.mubr.f32.vlgmr.msra.gmra.mxu1 %v1384_v7  ;;  %v1382_v10 = vmul.f32 0.5, %v1379_v9  ;;  %v2000_v7 = vld [vmem:[%s3211_s23] ss:$0 sm:$0xff]  ;;  %v1686_v9 = vadd.s32 32, %v2739_v8 }
 0xa5b   :  { %v2404_v11 = vpop.eup %2403  ;;  %2331 = vmatprep.mubr.msk.f32.mxu1 %vm2424_vm1, %v2423_v0  ;;  %2366 = vmatpush3.msra.mxu1 %v1694_v52 }
 0xa5c   :  { %v1385_v12 = vmul.f32 %v1382_v10, %v1352_v44  ;;  %v1380_v13 = vadd.f32 1.0, %v2404_v11  ;;  %2367 = vmatprep.subr.mxu1 %v2423_v0  ;;  %vm1687_vm14 = vcmp.eq.s32.totalorder %v2693_v48, %v1686_v9  ;;  %v1894_v9 = vsel %vm279_vm3, %v3120_v57, 0.0 }
 0xa5d   :  { %2368 = vmatpush3.msra.mxu1 %v1693_v53 }
 0xa5e   :  { %2332 = vmatmul.mubr.f32.gmra.mxu1 %v1385_v12  ;;  %v1383_v14 = vmul.f32 0.5, %v1380_v13 }
 0xa5f   :  { %2334 = vmatprep.mubr.msk.f32.mxu1 %vm2424_vm1, %v2423_v0 }
 0xa60   :  { %v1386_v16 = vmul.f32 %v1383_v14, %v1357_v54  ;;  %v3102_v54 = vld [vmem:[%s3209_s5] sm:$0xff] }
 0xa62   :  { %2335 = vmatmul.mubr.f32.gmra.mxu1 %v1386_v16 }
 0xa63   :  { %2369 = vmatprep.mubr.msk.f32.mxu1 %vm2424_vm1, %v2423_v0 }
 0xa66   :  { %2370 = vmatmul.mubr.msk.f32.vlgmr.msra.gmra.mxu1 %vm279_vm3, %v3102_v54 }
 0xa67   :  { %2372 = vmatprep.mubr.msk.f32.mxu1 %vm2424_vm1, %v2423_v0 }
 0xa6a   :  { %2373 = vmatmul.mubr.msk.f32.gmra.mxu1 %vm279_vm3, %v3111_v55 }
 0xa6b   :  { %2375 = vmatprep.mubr.msk.f32.mxu1 %vm2424_vm1, %v2423_v0 }
 0xa6e   :  { %2376 = vmatmul.mubr.msk.f32.gmra.mxu1 %vm279_vm3, %v3120_v57 }
 0xb1a   :  { %v1469_v17 = vpop.f32.mrf.mxu1 }
 0xb1b   :  { %v1483_v20 = vadd.f32 %v1469_v17, %v2967_v15  ;;  %v2425_v17 = vmov 1.0  }
 0xb1c   :  { %v2330_v21 = vpop.f32.mrf.mxu1 }
 0xb1d   :  { %v1493_v50 = vadd.f32 %v1998_v19, %v1483_v20 }
 0xb1e   :  { %v1474_v22 = vpop.f32.mrf.mxu1 }
 0xb1f   :  { %v1484_v56 = vadd.f32 %v1474_v22, %v2974_v18  ;;  %v1496_v23 = vsel %vm203_vm2, %v1493_v50, 0.0  ;;  %v3154_v22 = vld [vmem:[%s3212_s6 + $0x8] sm:$0xff] }
 0xb20   :  { %1497 = vadd.xlane.f32.xlu1 %v1496_v23  ;;  %v2333_v24 = vpop.f32.mrf.mxu1 }
 0xb21   :  { %v1494_v25 = vadd.f32 %v1998_v19, %v1484_v56  ;;  %v3163_v56 = vld [vmem:[%s3212_s6 + $0x10] sm:$0xff] }
 0xb22   :  { %v1479_v26 = vpop.f32.mrf.mxu1 }
 0xb23   :  { %v1485_v27 = vadd.f32 %v1479_v26, %v2981_v42  ;;  %v1499_v28 = vsel %vm203_vm2, %v1494_v25, 0.0 }
 0xb24   :  { %1500 = vadd.xlane.f32.xlu0 %v1499_v28  ;;  %v2336_v29 = vpop.f32.mrf.mxu1 }
 0xb25   :  { %v1495_v30 = vadd.f32 %v1998_v19, %v1485_v27  ;;  %v2001_v29 = vld [vmem:[%s3213_s25] ss:$0 sm:$0xff] }
 0xb26   :  { %v1862_v23 = vpop.f32.mrf.mxu1 }
 0xb27   :  { %v1502_v15 = vsel %vm203_vm2, %v1495_v30, 0.0 }
 0xb28   :  { %1503 = vadd.xlane.f32.xlu1 %v1502_v15  ;;  %v2371_v24 = vpop.f32.mrf.mxu1 }
 0xba9   :  { %v1498_v31 = vpop.xlane.xlu1 %1497 }
 0xbaa   :  { %v1506_v32 = vmul.f32 0.03125, %v1498_v31 }
 0xbac   :  { %v1509_v33 = vsub.f32 %v1493_v50, %v1506_v32  ;;  %v3145_v50 = vld [vmem:[%s3212_s6] sm:$0xff] }
 0xbad   :  { %v1501_v18 = vpop.xlane.xlu0 %1500 }
 0xbae   :  { %v1507_v34 = vmul.f32 0.03125, %v1501_v18  ;;  %v1512_v35 = vmul.f32 %v1509_v33, %v1509_v33 }
 0xbb0   :  { %v1510_v36 = vsub.f32 %v1494_v25, %v1507_v34  ;;  %v1515_v37 = vsel %vm203_vm2, %v1512_v35, 0.0  ;;  %v1867_v25 = vpop.f32.mrf.mxu1 }
 0xbb1   :  { %1516 = vadd.xlane.f32.xlu0 %v1515_v37  ;;  %v1504_v38 = vpop.xlane.xlu1 %1503 }
 0xbb2   :  { %v1508_v42 = vmul.f32 0.03125, %v1504_v38  ;;  %v1513_v39 = vmul.f32 %v1510_v36, %v1510_v36  ;;  %v2374_v26 = vpop.f32.mrf.mxu1 }
 0xbb4   :  { %v3070_v40 = vsub.f32 %v1495_v30, %v1508_v42  ;;  %v1518_v41 = vsel %vm203_vm2, %v1513_v39, 0.0  ;;  %v1872_v27 = vpop.f32.mrf.mxu1 }
 0xbb5   :  { %1519 = vadd.xlane.f32.xlu1 %v1518_v41 }
 0xbb6   :  { %v1514_v43 = vmul.f32 %v3070_v40, %v3070_v40  ;;  %v2377_v28 = vpop.f32.mrf.mxu1 }
 0xbb8   :  { %v1521_v44 = vsel %vm203_vm2, %v1514_v43, 0.0 }
 0xbb9   :  { %1522 = vadd.xlane.f32.xlu0 %v1521_v44 }
 0xc3a   :  { %v1517_v58 = vpop.xlane.xlu0 %1516 }
 0xc3b   :  { %v1524_v59 = vmul.f32 0.03125, %v1517_v58 }
 0xc3d   :  { %v1527_v60 = vadd.f32 1e-05, %v1524_v59 }
 0xc3e   :  { %v1520_v61 = vpop.xlane.xlu1 %1519 }
 0xc3f   :  { %2405 = vrsqrt.f32 %v1527_v60  ;;  %v1525_v62 = vmul.f32 0.03125, %v1520_v61 }
 0xc41   :  { %v1528_v63 = vadd.f32 1e-05, %v1525_v62 }
 0xc42   :  { %v1523_v1 = vpop.xlane.xlu0 %1522 }
 0xc43   :  { %2407 = vrsqrt.f32 %v1528_v63  ;;  %v1526_v2 = vmul.f32 0.03125, %v1523_v1 }
 0xc45   :  { %v1529_v3 = vadd.f32 1e-05, %v1526_v2 }
 0xc47   :  { %2409 = vrsqrt.f32 %v1529_v3 }
 0xc4c   :  { %v2406_v4 = vpop.eup %2405 }
 0xc4d   :  { %v1533_v6 = vmul.f32 %v2406_v4, %v1509_v33  ;;  %v1888_v4 = vsel %vm279_vm3, %v3102_v54, 0.0 }
 0xc4f   :  { %v1543_v10 = vmul.f32 %v1999_v5, %v1533_v6  ;;  %v1897_v6 = vsel %vm480_vm7, %v3145_v50, 0.0 }
 0xc50   :  { %v2408_v11 = vpop.eup %2407 }
 0xc51   :  { %v1553_v12 = vadd.f32 %v2000_v7, %v1543_v10  ;;  %v1534_v13 = vmul.f32 %v2408_v11, %v1510_v36  ;;  %v1903_v10 = vsel %vm480_vm7, %v3163_v56, 0.0 }
 0xc53   :  { %2346 = vmatmul.mubr.msk.f32.vlgmr.msra.gmra.mxu0 %vm203_vm2, %v1553_v12  ;;  %v1544_v14 = vmul.f32 %v1999_v5, %v1534_v13 }
 0xc54   :  { %v2410_v16 = vpop.eup %2409  ;;  %2355 = vmatpush3.msk.msra.mxu0 %vm1687_vm14, %v2425_v17  ;;  %2348 = vmatprep.mubr.msk.f32.mxu0 %vm2424_vm1, %v2423_v0 }
 0xc55   :  { %v1554_v19 = vadd.f32 %v2000_v7, %v1544_v14  ;;  %v1535_v20 = vmul.f32 %v2410_v16, %v3070_v40 }
 0xc57   :  { %2349 = vmatmul.mubr.msk.f32.gmra.mxu0 %vm203_vm2, %v1554_v19  ;;  %v1545_v8 = vmul.f32 %v1999_v5, %v1535_v20  ;;  %v1891_v5 = vsel %vm279_vm3, %v3111_v55, 0.0 }
 0xc58   :  { %2351 = vmatprep.mubr.msk.f32.mxu0 %vm2424_vm1, %v2423_v0 }
 0xc59   :  { %v1555_v21 = vadd.f32 %v2000_v7, %v1545_v8  ;;  %v1900_v7 = vsel %vm480_vm7, %v3154_v22, 0.0 }
 0xc5b   :  { %2352 = vmatmul.mubr.msk.f32.gmra.mxu0 %vm203_vm2, %v1555_v21  ;;  %vm1948_vm2 = vcmp.eq.s32.totalorder %v2693_v48, 1 }
 0xc5c   :  { %2356 = vmatprep.mubr.msk.f32.mxu0 %vm2424_vm1, %v2423_v0 }
 0xc5f   :  { %2357 = vmatmul.mubr.msk.f32.vlgmr.msra.gmra.mxu0 %vm480_vm7, %v3145_v50 }
 0xc60   :  { %2359 = vmatprep.mubr.msk.f32.mxu0 %vm2424_vm1, %v2423_v0 }
 0xc63   :  { %2360 = vmatmul.mubr.msk.f32.gmra.mxu0 %vm480_vm7, %v3154_v22 }
 0xc64   :  { %2362 = vmatprep.mubr.msk.f32.mxu0 %vm2424_vm1, %v2423_v0  ;;  %vm1944_vm1 = vcmp.eq.s32.totalorder %v2693_v48, 0 }
 0xc67   :  { %2363 = vmatmul.mubr.msk.f32.gmra.mxu0 %vm480_vm7, %v3163_v56 }
 0xd13   :  { %v1642_v30 = vpop.f32.mrf.mxu0 }
 0xd14   :  { %v1643_v0 = vadd.f32 %v2001_v29, %v1642_v30 }
 0xd15   :  { %v2347_v15 = vpop.f32.mrf.mxu0 }
 0xd16   :  { %1656 = vmax.xlane.f32.xlu1 %v1643_v0 }
 0xd17   :  { %v1647_v31 = vpop.f32.mrf.mxu0 }
 0xd18   :  { %v1648_v32 = vadd.f32 %v2001_v29, %v1647_v31 }
 0xd19   :  { %v2350_v33 = vpop.f32.mrf.mxu0 }
 0xd1a   :  { %1658 = vmax.xlane.f32.xlu0 %v1648_v32 }
 0xd1b   :  { %v1652_v18 = vpop.f32.mrf.mxu0 }
 0xd1c   :  { %v1653_v34 = vadd.f32 %v2001_v29, %v1652_v18 }
 0xd1d   :  { %v2353_v35 = vpop.f32.mrf.mxu0 }
 0xd1e   :  { %1660 = vmax.xlane.f32.xlu1 %v1653_v34 }
 0xd1f   :  { %v1773_v36 = vpop.f32.mrf.mxu0 }
 0xd20   :  { %v1863_v59 = vadd.f32 %v1862_v23, %v1773_v36 }
 0xd21   :  { %v2358_v37 = vpop.f32.mrf.mxu0 }
 0xd22   :  { %v1876_v63 = vmul.f32 %v1863_v59, %v1643_v0 }
 0xd23   :  { %v1778_v38 = vpop.f32.mrf.mxu0 }
 0xd24   :  { %v1868_v61 = vadd.f32 %v1867_v25, %v1778_v38 }
 0xd25   :  { %v2361_v42 = vpop.f32.mrf.mxu0 }
 0xd26   :  { %v1877_v2 = vmul.f32 %v1868_v61, %v1648_v32 }
 0xd27   :  { %v1783_v39 = vpop.f32.mrf.mxu0 }
 0xd28   :  { %v1873_v62 = vadd.f32 %v1872_v27, %v1783_v39 }
 0xd29   :  { %v2364_v40 = vpop.f32.mrf.mxu0 }
 0xd2a   :  { %v1878_v3 = vmul.f32 %v1873_v62, %v1653_v34 }
 0xd9f   :  { %v1657_v41 = vpop.xlane.xlu1 %1656 }
 0xda0   :  { %v1662_v43 = vsub.f32 %v1643_v0, %v1657_v41 }
 0xda2   :  { %v1665_v44 = vmul.f32 1.442695, %v1662_v43 }
 0xda3   :  { %v1659_v45 = vpop.xlane.xlu0 %1658 }
 0xda4   :  { %2411 = vpow2.f32 %v1665_v44  ;;  %v1663_v46 = vsub.f32 %v1648_v32, %v1659_v45 }
 0xda6   :  { %v1667_v49 = vmul.f32 1.442695, %v1663_v46 }
 0xda7   :  { %v1661_v51 = vpop.xlane.xlu1 %1660 }
 0xda8   :  { %2413 = vpow2.f32 %v1667_v49  ;;  %v1664_v52 = vsub.f32 %v1653_v34, %v1661_v51 }
 0xdaa   :  { %v1669_v53 = vmul.f32 1.442695, %v1664_v52 }
 0xdac   :  { %2415 = vpow2.f32 %v1669_v53 }
 0xdb1   :  { %v2412_v58 = vpop.eup %2411 }
 0xdb2   :  { %1671 = vadd.xlane.f32.xlu0 %v2412_v58 }
 0xdb5   :  { %v2414_v60 = vpop.eup %2413 }
 0xdb6   :  { %1673 = vadd.xlane.f32.xlu1 %v2414_v60 }
 0xdb9   :  { %v2416_v1 = vpop.eup %2415 }
 0xdba   :  { %1675 = vadd.xlane.f32.xlu0 %v2416_v1  ;;  %1879 = vadd.xlane.f32.xlu1 %v1876_v63 }
 0xdbe   :  { %1881 = vadd.xlane.f32.xlu0 %v1877_v2  ;;  %1883 = vadd.xlane.f32.xlu1 %v1878_v3  ;;  %v1942_v2 = vshrl.u32 %v277_v47, 7 }
 0xdc0   :  { %vm1943_vm0 = vcmp.eq.s32.totalorder %v1942_v2, 0 }
 0xdc1   :  { %vm1945_vm3 = vmand %vm1943_vm0, %vm1944_vm1 }
 0xdc2   :  { %1889 = vadd.xlane.f32.xlu0 %v1888_v4  ;;  %1892 = vadd.xlane.f32.xlu1 %v1891_v5  ;;  %vm1949_vm4 = vmand %vm1943_vm0, %vm1948_vm2 }
 0xdc6   :  { %1898 = vadd.xlane.f32.xlu0 %v1897_v6  ;;  %1901 = vadd.xlane.f32.xlu1 %v1900_v7 }
 0xdca   :  { %1895 = vadd.xlane.f32.xlu0 %v1894_v9  ;;  %1904 = vadd.xlane.f32.xlu1 %v1903_v10 }
 0xe3b   :  { %v1672_v54 = vpop.xlane.xlu0 %1671 }
 0xe3c   :  { %2417 = vlog2.f32 %v1672_v54 }
 0xe3f   :  { %v1674_v55 = vpop.xlane.xlu1 %1673 }
 0xe40   :  { %2419 = vlog2.f32 %v1674_v55 }
 0xe43   :  { %v1676_v11 = vpop.xlane.xlu0 %1675  ;;  %v1880_v12 = vpop.xlane.xlu1 %1879 }
 0xe44   :  { %2421 = vlog2.f32 %v1676_v11 }
 0xe47   :  { %v1882_v13 = vpop.xlane.xlu0 %1881  ;;  %v1884_v14 = vpop.xlane.xlu1 %1883 }
 0xe49   :  { %v2418_v16 = vpop.eup %2417 }
 0xe4a   :  { %v1678_v17 = vmul.f32 0.6931472, %v2418_v16 }
 0xe4b   :  { %v1890_v19 = vpop.xlane.xlu0 %1889  ;;  %v1893_v20 = vpop.xlane.xlu1 %1892 }
 0xe4c   :  { %v1683_v8 = vadd.f32 %v1678_v17, %v1657_v41 }
 0xe4d   :  { %v2420_v57 = vpop.eup %2419 }
 0xe4e   :  { %v1680_v21 = vmul.f32 0.6931472, %v2420_v57  ;;  %v1885_v50 = vsub.f32 %v1683_v8, %v1880_v12 }
 0xe4f   :  { %v1902_v22 = vpop.xlane.xlu1 %1901  ;;  %v1899_v24 = vpop.xlane.xlu0 %1898 }
 0xe50   :  { %v1684_v56 = vadd.f32 %v1680_v21, %v1659_v45  ;;  %v1906_v27 = vmul.f32 %v1890_v19, %v1885_v50  ;;  %v1924_v29 = vmul.f32 %v1899_v24, %v1885_v50 }
 0xe51   :  { %v2422_v23 = vpop.eup %2421 }
 0xe52   :  { %v1682_v25 = vmul.f32 0.6931472, %v2422_v23  ;;  %v1886_v26 = vsub.f32 %v1684_v56, %v1882_v13  ;;  %v1910_v34 = vsel %vm1909_vm15, %v1906_v27, 0.0  ;;  %v1927_v35 = vsel %vm1909_vm15, %v1924_v29, 0.0 }
 0xe53   :  { %v1896_v15 = vpop.xlane.xlu0 %1895  ;;  %v1905_v31 = vpop.xlane.xlu1 %1904 }
 0xe54   :  { %v1685_v28 = vadd.f32 %v1682_v25, %v1661_v51  ;;  %v1907_v30 = vmul.f32 %v1893_v20, %v1886_v26  ;;  %v1925_v0 = vmul.f32 %v1902_v22, %v1886_v26 }
 0xe56   :  { %v1887_v32 = vsub.f32 %v1685_v28, %v1884_v14  ;;  %v1911_v33 = vsel %vm1909_vm15, %v1907_v30, 0.0  ;;  %v1928_v18 = vsel %vm1909_vm15, %v1925_v0, 0.0 }
 0xe57   :  { %v1912_v38 = vadd.f32 %v1911_v33, %v1910_v34  ;;  %v1929_v42 = vadd.f32 %v1928_v18, %v1927_v35 }
 0xe58   :  { %v1908_v36 = vmul.f32 %v1896_v15, %v1887_v32  ;;  %v1926_v37 = vmul.f32 %v1905_v31, %v1887_v32 }
 0xe5a   :  { %v1913_v39 = vsel %vm1909_vm15, %v1908_v36, 0.0  ;;  %v1930_v40 = vsel %vm1909_vm15, %v1926_v37, 0.0 }
 0xe5b   :  { %v1914_v41 = vadd.f32 %v1913_v39, %v1912_v38  ;;  %v1931_v43 = vadd.f32 %v1930_v40, %v1929_v42 }
 0xe5d   :  { %1915 = vadd.xlane.f32.xlu0 %v1914_v41  ;;  %1932 = vadd.xlane.f32.xlu1 %v1931_v43 }
 0xee6   :  { %v1916_v44 = vpop.xlane.xlu0 %1915  ;;  %v1933_v45 = vpop.xlane.xlu1 %1932 }
 0xee7   :  { %v1917_v46 = vrot.slane %v1916_v44, 4  ;;  %v1934_v49 = vrot.slane %v1933_v45, 4 }
 0xee9   :  { %v1918_v51 = vadd.f32 %v1917_v46, %v1916_v44  ;;  %v1935_v52 = vadd.f32 %v1934_v49, %v1933_v45 }
 0xeeb   :  { %v1919_v53 = vrot.slane %v1918_v51, 2  ;;  %v1936_v58 = vrot.slane %v1935_v52, 2 }
 0xeed   :  { %v1937_v59 = vadd.f32 %v1936_v58, %v1935_v52  ;;  %v1920_v60 = vadd.f32 %v1919_v53, %v1918_v51 }
 0xeef   :  { %v1921_v61 = vrot.slane %v1920_v60, 1  ;;  %v1938_v62 = vrot.slane %v1937_v59, 1 }
 0xef1   :  { %v1922_v63 = vadd.f32 %v1921_v61, %v1920_v60  ;;  %v1939_v1 = vadd.f32 %v1938_v62, %v1937_v59 }
 0xef3   :  { %2378 = vpush %v1922_v63 }
 0xef4   :  { %2380 = vpush %v1939_v1 }
 0xf24   :  { %s2379_s6 = spop %2378 }
 0xf25   :  { %v1946_v3 = vstv %s2379_s6  ;;  %s2381_s25 = spop %2380 }
 0xf26   :  { %v1947_v4 = vsel %vm1945_vm3, %v1946_v3, 0.0  ;;  %v1950_v5 = vstv %s2381_s25 }
 0xf27   :  { %v1951_v6 = vsel %vm1949_vm4, %v1950_v5, 0.0 }
 0xf28   :  { %v1952_v7 = vadd.f32 %v1951_v6, %v1947_v4 }
 0xf2a   :  { %1953 = vst [vmem:[%s3214_s26] sm:$0xff] %v1952_v7 }

</bundles_post_ra>
